<compile_context>
chip_gen: v6e
topology: v6e:2x2x1
jax: 0.10.0
libtpu: 0.0.40
codegen_flags: <defaults>
</compile_context>

<pallas_src>
import functools

import jax
import jax.numpy as jnp
import numpy as np
from jax.experimental import pallas as pl
from jax.experimental.pallas import tpu as pltpu


def _round_up(x, m):
    return (x + m - 1) // m * m


def _cdiv(a, b):
    return -(-a // b)


def _pick_m_tiling(m, target_tile=1024, granule=16):
    """Pick (tile_m, m_pad, n_tiles): ~target rows per tile, even tile count when
    tiled (v7x 2-TC balance), 16-row granule for bf16 (16,128) block alignment."""
    n_tiles = max(1, _cdiv(m, target_tile))
    if n_tiles > 1 and n_tiles % 2:
        n_tiles += 1
    tile_m = _round_up(_cdiv(m, n_tiles), granule)
    return tile_m, n_tiles * tile_m, n_tiles


# ----------------------------------------------------------------------------
# Pallas kernel 1a: fused block-complex matmul + per-tile BN partial sums.
# ----------------------------------------------------------------------------
def _cconvt_stats_kernel(p_ref, w_ref, y_ref, sum_ref, sq_ref):
    # p: (TILE_M, K2p) bf16 ; w: (K2p, C2p) bf16 (VMEM-resident, constant map)
    y = jnp.dot(p_ref[...], w_ref[...], preferred_element_type=jnp.float32)
    y_ref[...] = y.astype(y_ref.dtype)
    # Zero pad rows contribute 0 to both sums (no bias folded in on this path),
    # so dividing by the true M outside gives unbiased batch statistics.
    sum_ref[...] = jnp.sum(y, axis=0, keepdims=True)[None]
    sq_ref[...] = jnp.sum(y * y, axis=0, keepdims=True)[None]


# ----------------------------------------------------------------------------
# Pallas kernel 1b (last layer): matmul + f32 bias + phase * tanh(|.|) fused.
# ----------------------------------------------------------------------------
def _cconvt_tanh_kernel(p_ref, w_ref, b_ref, o_ref):
    y = jnp.dot(p_ref[...], w_ref[...], preferred_element_type=jnp.float32)
    y = y + b_ref[...]                       # bias added in f32 (not bf16-folded)
    a = jnp.abs(y)
    o_ref[...] = y * jnp.tanh(a) * pl.reciprocal(a + 1e-8, approx=True)


# ----------------------------------------------------------------------------
# Pallas kernel 2: batch-norm apply + LeakyReLU (lane-dense elementwise).
# ----------------------------------------------------------------------------
def _bn_lrelu_kernel(y_ref, scale_ref, shift_ref, o_ref, *, negative_slope):
    z = y_ref[...].astype(jnp.float32) * scale_ref[...] + shift_ref[...]
    o_ref[...] = jnp.where(z >= 0, z, negative_slope * z)


# ----------------------------------------------------------------------------
# Plain-JAX glue: transposed conv -> stride-1 conv patches of the dilated input
# (single fused XLA op; K minor order (c, kh, kw) matches the weight matrix).
# ----------------------------------------------------------------------------
def _im2col_patches(x_plane, kh, kw, sh, sw, ph, pw, oph, opw, oh, ow):
    n = x_plane.shape[0]
    pads = ((kh - 1 - ph, kh - 1 - ph + oph), (kw - 1 - pw, kw - 1 - pw + opw))
    p = jax.lax.conv_general_dilated_patches(
        x_plane, filter_shape=(kh, kw), window_strides=(1, 1),
        padding=pads, lhs_dilation=(sh, sw))        # (N, C*KH*KW, OH, OW)
    return p.transpose(0, 2, 3, 1).reshape(n * oh * ow, -1)


# ----------------------------------------------------------------------------
# Decoder forward
# ----------------------------------------------------------------------------
def decoder_forward(x, w_real, b_real, w_im, b_im, gamma2, beta2, *,
                    stride=(2, 2), padding=(0, 0), output_padding=(0, 0),
                    last_layer=False, eps=1e-5, negative_slope=0.01,
                    target_tile_m=1024, compute_dtype=jnp.bfloat16):
    """x: (N,Cin,H,W,2) f32. w_*: (Cin,Cout,KH,KW) (PyTorch ConvTranspose2d layout).
    b_*: (Cout,). gamma2/beta2: (2*Cout,) = concat of real/imag BN affine params."""
    n, cin, h, w, _ = x.shape
    _, cout, kh, kw = w_real.shape
    sh, sw = stride
    ph, pw = padding
    oph, opw = output_padding

    oh = (h - 1) * sh - 2 * ph + kh + oph
    ow = (w - 1) * sw - 2 * pw + kw + opw
    m = n * oh * ow
    k = cin * kh * kw

    # --- im2col of the zero-dilated / edge-padded input (stride-1 conv equiv) ---
    x_real, x_im = x[..., 0], x[..., 1]
    pr = _im2col_patches(x_real, kh, kw, sh, sw, ph, pw, oph, opw, oh, ow)
    pi = _im2col_patches(x_im, kh, kw, sh, sw, ph, pw, oph, opw, oh, ow)

    # ConvTranspose weight (Cin,Cout,KH,KW) -> stride-1 conv matrix (K, Cout):
    #   w_conv[(ci,a,b), co] = w_t[ci, co, KH-1-a, KW-1-b]
    def as_mat(w_t):
        return jnp.flip(w_t, axis=(2, 3)).transpose(0, 2, 3, 1).reshape(k, cout)

    wr, wi = as_mat(w_real), as_mat(w_im)

    # Block-complex weight:  [Pr | Pi] @ [[ Wr, Wi], [-Wi, Wr]] = [real | imag]
    w_blk = jnp.concatenate([jnp.concatenate([wr, wi], axis=1),
                             jnp.concatenate([-wi, wr], axis=1)], axis=0)  # (2K, 2Cout)

    k2, c2 = 2 * k, 2 * cout
    k2p = _round_up(k2, 128)
    c2p = _round_up(c2, 128)
    tile_m, m_pad, n_tiles = _pick_m_tiling(m, target_tile_m)

    p_pad = (jnp.zeros((m_pad, k2p), compute_dtype)
             .at[:m, :k].set(pr.astype(compute_dtype))
             .at[:m, k:k2].set(pi.astype(compute_dtype)))
    w_pad = jnp.zeros((k2p, c2p), compute_dtype).at[:k2, :c2].set(
        w_blk.astype(compute_dtype))

    grid = (n_tiles,)
    p_spec = pl.BlockSpec((tile_m, k2p), lambda i: (i, 0))       # M-tiled patches
    w_spec = pl.BlockSpec((k2p, c2p), lambda i: (0, 0))          # VMEM-resident weights
    slab_spec = pl.BlockSpec((tile_m, c2p), lambda i: (i, 0))    # lane-dense slab
    vec_spec = pl.BlockSpec((1, c2p), lambda i: (0, 0))          # resident per-lane params
    sum_spec = pl.BlockSpec((1, 1, c2p), lambda i: (i, 0, 0))    # per-tile partial sums
    cparams = pltpu.CompilerParams(dimension_semantics=("parallel",))

    if last_layer:
        # ct_real bias = (b_real - b_im); ct_im bias = (b_real + b_im).
        bias_row = jnp.zeros((1, c2p), jnp.float32).at[0, :c2].set(
            jnp.concatenate([b_real - b_im, b_real + b_im]))
        cost = pl.CostEstimate(
            flops=2 * m_pad * k2p * c2p + 5 * m_pad * c2p,
            transcendentals=2 * m_pad * c2p,
            bytes_accessed=p_pad.size * 2 + w_pad.size * 2 + m_pad * c2p * 4)
        act = pl.pallas_call(
            _cconvt_tanh_kernel,
            out_shape=jax.ShapeDtypeStruct((m_pad, c2p), jnp.float32),
            grid=grid,
            in_specs=[p_spec, w_spec, vec_spec],
            out_specs=slab_spec,
            compiler_params=cparams,
            cost_estimate=cost,
        )(p_pad, w_pad, bias_row)
    else:
        # Bias is omitted here: a per-channel constant is removed exactly by
        # batch norm, so skipping it keeps the padded rows all-zero (unbiased
        # in-kernel partial sums) and avoids bf16 bias rounding entirely.
        cost = pl.CostEstimate(
            flops=2 * m_pad * k2p * c2p + 3 * m_pad * c2p,
            transcendentals=0,
            bytes_accessed=p_pad.size * 2 + w_pad.size * 2 + m_pad * c2p * 2)
        conv, tsum, tsq = pl.pallas_call(
            _cconvt_stats_kernel,
            out_shape=(jax.ShapeDtypeStruct((m_pad, c2p), compute_dtype),
                       jax.ShapeDtypeStruct((n_tiles, 1, c2p), jnp.float32),
                       jax.ShapeDtypeStruct((n_tiles, 1, c2p), jnp.float32)),
            grid=grid,
            in_specs=[p_spec, w_spec],
            out_specs=(slab_spec, sum_spec, sum_spec),
            compiler_params=cparams,
            cost_estimate=cost,
        )(p_pad, w_pad)

        # Training-mode batch stats (biased variance) from tiny partial sums --
        # no re-read of the conv slab.
        mean = jnp.sum(tsum, axis=(0, 1)) / m
        var = jnp.maximum(jnp.sum(tsq, axis=(0, 1)) / m - mean * mean, 0.0)
        gamma_p = jnp.zeros((c2p,), jnp.float32).at[:c2].set(gamma2)
        beta_p = jnp.zeros((c2p,), jnp.float32).at[:c2].set(beta2)
        scale = gamma_p * jax.lax.rsqrt(var + eps)
        shift = beta_p - mean * scale

        act = pl.pallas_call(
            functools.partial(_bn_lrelu_kernel, negative_slope=negative_slope),
            out_shape=jax.ShapeDtypeStruct((m_pad, c2p), jnp.float32),
            grid=grid,
            in_specs=[slab_spec, vec_spec, vec_spec],
            out_specs=slab_spec,
            compiler_params=cparams,
        )(conv, scale.reshape(1, c2p), shift.reshape(1, c2p))

    # (M_pad, C2p) slab -> (N, Cout, OH, OW, 2)
    y = act[:m]
    c_real = y[:, :cout].reshape(n, oh, ow, cout).transpose(0, 3, 1, 2)
    c_im = y[:, cout:c2].reshape(n, oh, ow, cout).transpose(0, 3, 1, 2)
    return jnp.stack([c_real, c_im], axis=-1)


# ----------------------------------------------------------------------------
# Independent numpy reference (scatter-form transposed conv, BN, LeakyReLU)
# ----------------------------------------------------------------------------
def _reference_decoder(x, w_real, b_real, w_im, b_im, gamma2, beta2,
                       stride, padding, output_padding, last_layer,
                       eps=1e-5, negative_slope=0.01):
    x = np.asarray(x, np.float64)
    wr, wi = np.asarray(w_real, np.float64), np.asarray(w_im, np.float64)
    br, bi = np.asarray(b_real, np.float64), np.asarray(b_im, np.float64)
    n, cin, h, w, _ = x.shape
    _, cout, kh, kw = wr.shape
    sh, sw = stride
    assert padding == (0, 0) and output_padding == (0, 0)  # test uses Decoder defaults

    def convt(xp, wt, b):
        ohf, owf = (h - 1) * sh + kh, (w - 1) * sw + kw
        out = np.zeros((n, cout, ohf, owf))
        for i in range(h):
            for j in range(w):
                out[:, :, i * sh:i * sh + kh, j * sw:j * sw + kw] += np.einsum(
                    "nc,cokl->nokl", xp[:, :, i, j], wt)
        return out + b[None, :, None, None]

    xr, xi = x[..., 0], x[..., 1]
    c_real = convt(xr, wr, br) - convt(xi, wi, bi)
    c_im = convt(xr, wi, bi) + convt(xi, wr, br)

    if last_layer:
        conved = np.stack([c_real, c_im], axis=-1)
        a = np.abs(conved)
        return conved / (a + 1e-8) * np.tanh(a)

    g, be = np.asarray(gamma2, np.float64), np.asarray(beta2, np.float64)

    def bn(y, gg, bb):
        mean = y.mean(axis=(0, 2, 3), keepdims=True)
        var = y.var(axis=(0, 2, 3), keepdims=True)
        return (y - mean) / np.sqrt(var + eps) * gg[None, :, None, None] \
            + bb[None, :, None, None]

    normed = np.stack([bn(c_real, g[:cout], be[:cout]),
                       bn(c_im, g[cout:], be[cout:])], axis=-1)
    return np.where(normed >= 0, normed, negative_slope * normed)


if __name__ == "__main__":
    # Decoder defaults: filter (7,5), stride (2,2), in_channels=1, out_channels=45.
    N, CIN, COUT = 2, 1, 45
    H, W = 16, 16
    KSIZE, STRIDE, PAD, OPAD = (7, 5), (2, 2), (0, 0), (0, 0)

    key = jax.random.PRNGKey(0)
    kx, kwr, kwi, kbr, kbi = jax.random.split(key, 5)
    x = jax.random.normal(kx, (N, CIN, H, W, 2), dtype=jnp.float32)

    kh, kw_ = KSIZE
    fan_in = COUT * kh * kw_            # PyTorch fan for (Cin, Cout, KH, KW) weight
    fan_out = CIN * kh * kw_
    xb = float(np.sqrt(6.0 / (fan_in + fan_out)))
    bb = 1.0 / float(np.sqrt(fan_in))
    w_real = jax.random.uniform(kwr, (CIN, COUT, kh, kw_), jnp.float32, -xb, xb)
    w_im = jax.random.uniform(kwi, (CIN, COUT, kh, kw_), jnp.float32, -xb, xb)
    b_real = jax.random.uniform(kbr, (COUT,), jnp.float32, -bb, bb)
    b_im = jax.random.uniform(kbi, (COUT,), jnp.float32, -bb, bb)
    gamma2 = jnp.ones((2 * COUT,), jnp.float32)
    beta2 = jnp.zeros((2 * COUT,), jnp.float32)

    OH = (H - 1) * STRIDE[0] + KSIZE[0]
    OW = (W - 1) * STRIDE[1] + KSIZE[1]

    # Default path: CConvTranspose2d -> CBatchNorm2d -> LeakyReLU
    fwd = jax.jit(functools.partial(decoder_forward, stride=STRIDE, padding=PAD,
                                    output_padding=OPAD, last_layer=False))
    out = jax.block_until_ready(fwd(x, w_real, b_real, w_im, b_im, gamma2, beta2))
    assert out.shape == (N, COUT, OH, OW, 2)
    ref = _reference_decoder(x, w_real, b_real, w_im, b_im, gamma2, beta2,
                             STRIDE, PAD, OPAD, last_layer=False)
    np.testing.assert_allclose(np.asarray(out), ref, rtol=1e-1, atol=1e-1)

    # Last-layer path: phase * tanh(|.|), fused into the matmul kernel.
    fwd_last = jax.jit(functools.partial(decoder_forward, stride=STRIDE, padding=PAD,
                                         output_padding=OPAD, last_layer=True))
    out_last = jax.block_until_ready(
        fwd_last(x, w_real, b_real, w_im, b_im, gamma2, beta2))
    assert out_last.shape == (N, COUT, OH, OW, 2)
    ref_last = _reference_decoder(x, w_real, b_real, w_im, b_im, gamma2, beta2,
                                  STRIDE, PAD, OPAD, last_layer=True)
    np.testing.assert_allclose(np.asarray(out_last), ref_last, rtol=5e-2, atol=5e-2)

    print("KERNEL_OK")
</pallas_src>

<mosaic_0001>
module attributes {stable_mosaic.version = 11 : i64} {
  func.func @_cconvt_stats_kernel(%arg0: i32, %arg1: memref<656x128xbf16, #tpu.memory_space<vmem>>, %arg2: memref<128x128xbf16, #tpu.memory_space<vmem>>, %arg3: memref<656x128xbf16, #tpu.memory_space<vmem>>, %arg4: memref<1x1x128xf32, #tpu.memory_space<vmem>>, %arg5: memref<1x1x128xf32, #tpu.memory_space<vmem>>) attributes {dimension_semantics = [#tpu.dimension_semantics<parallel>], iteration_bounds = array<i64: 4>, scalar_prefetch = 0 : i64, scratch_operands = 0 : i64, tpu.core_type = #tpu.core_type<tc>, window_params = [{transform_indices = @transform_0, window_bounds = array<i64: 656, 128>}, {pipeline_mode = #tpu.pipeline_mode<synchronous>, transform_indices = @transform_1, window_bounds = array<i64: 128, 128>}, {transform_indices = @transform_2, window_bounds = array<i64: 656, 128>}, {transform_indices = @transform_3, window_bounds = array<i64: 1, 1, 128>}, {transform_indices = @transform_4, window_bounds = array<i64: 1, 1, 128>}]} {
    %c0 = arith.constant 0 : index
    %c0_0 = arith.constant 0 : index
    %0 = vector.load %arg1[%c0, %c0_0] : memref<656x128xbf16, #tpu.memory_space<vmem>>, vector<656x128xbf16>
    %c0_1 = arith.constant 0 : index
    %c0_2 = arith.constant 0 : index
    %1 = vector.load %arg2[%c0_1, %c0_2] : memref<128x128xbf16, #tpu.memory_space<vmem>>, vector<128x128xbf16>
    %cst = arith.constant dense<0.000000e+00> : vector<656x128xf32>
    %2 = tpu.matmul %0, %1, %cst {dimension_numbers = #tpu.dot_dimension_numbers<[1], [0], [0], [1], [0, 0, 1, 1], [], []>} : vector<656x128xbf16>, vector<128x128xbf16>, vector<656x128xf32> -> vector<656x128xf32>
    %3 = arith.truncf %2 : vector<656x128xf32> to vector<656x128xbf16>
    %c0_3 = arith.constant 0 : index
    %c0_4 = arith.constant 0 : index
    %4 = vector.load %arg3[%c0_3, %c0_4] : memref<656x128xbf16, #tpu.memory_space<vmem>>, vector<656x128xbf16>
    tpu.vector_store %arg3[%c0_3, %c0_4], %3 {strides = array<i32>} : memref<656x128xbf16, #tpu.memory_space<vmem>>, vector<656x128xbf16>,
    %cst_5 = arith.constant dense<0.000000e+00> : vector<128xf32>
    %5 = vector.multi_reduction <add>, %2, %cst_5 [0] : vector<656x128xf32> to vector<128xf32>
    %6 = vector.shape_cast %5 : vector<128xf32> to vector<1x128xf32>
    %7 = vector.shape_cast %6 : vector<1x128xf32> to vector<1x1x128xf32>
    %c0_6 = arith.constant 0 : index
    %c0_7 = arith.constant 0 : index
    %c0_8 = arith.constant 0 : index
    %8 = vector.load %arg4[%c0_6, %c0_7, %c0_8] : memref<1x1x128xf32, #tpu.memory_space<vmem>>, vector<1x1x128xf32>
    tpu.vector_store %arg4[%c0_6, %c0_7, %c0_8], %7 {strides = array<i32>} : memref<1x1x128xf32, #tpu.memory_space<vmem>>, vector<1x1x128xf32>,
    %9 = arith.mulf %2, %2 : vector<656x128xf32>
    %cst_9 = arith.constant dense<0.000000e+00> : vector<128xf32>
    %10 = vector.multi_reduction <add>, %9, %cst_9 [0] : vector<656x128xf32> to vector<128xf32>
    %11 = vector.shape_cast %10 : vector<128xf32> to vector<1x128xf32>
    %12 = vector.shape_cast %11 : vector<1x128xf32> to vector<1x1x128xf32>
    %c0_10 = arith.constant 0 : index
    %c0_11 = arith.constant 0 : index
    %c0_12 = arith.constant 0 : index
    %13 = vector.load %arg5[%c0_10, %c0_11, %c0_12] : memref<1x1x128xf32, #tpu.memory_space<vmem>>, vector<1x1x128xf32>
    tpu.vector_store %arg5[%c0_10, %c0_11, %c0_12], %12 {strides = array<i32>} : memref<1x1x128xf32, #tpu.memory_space<vmem>>, vector<1x1x128xf32>,
    return
  }
  func.func @transform_0(%arg0: i32) -> (i32, i32) {
    %c0_i32 = arith.constant 0 : i32
    %c0_i32_0 = arith.constant 0 : i32
    return %arg0, %c0_i32 : i32, i32
  }
  func.func @transform_1(%arg0: i32) -> (i32, i32) {
    %c0_i32 = arith.constant 0 : i32
    %c0_i32_0 = arith.constant 0 : i32
    %c0_i32_1 = arith.constant 0 : i32
    return %c0_i32, %c0_i32_0 : i32, i32
  }
  func.func @transform_2(%arg0: i32) -> (i32, i32) {
    %c0_i32 = arith.constant 0 : i32
    %c0_i32_0 = arith.constant 0 : i32
    return %arg0, %c0_i32 : i32, i32
  }
  func.func @transform_3(%arg0: i32) -> (i32, i32, i32) {
    %c0_i32 = arith.constant 0 : i32
    %c0_i32_0 = arith.constant 0 : i32
    %c0_i32_1 = arith.constant 0 : i32
    return %arg0, %c0_i32, %c0_i32_0 : i32, i32, i32
  }
  func.func @transform_4(%arg0: i32) -> (i32, i32, i32) {
    %c0_i32 = arith.constant 0 : i32
    %c0_i32_0 = arith.constant 0 : i32
    %c0_i32_1 = arith.constant 0 : i32
    return %arg0, %c0_i32, %c0_i32_0 : i32, i32, i32
  }
}

module attributes {stable_mosaic.version = 11 : i64} {
  func.func @_bn_lrelu_kernel(%arg0: i32, %arg1: memref<656x128xbf16, #tpu.memory_space<vmem>>, %arg2: memref<1x128xf32, #tpu.memory_space<vmem>>, %arg3: memref<1x128xf32, #tpu.memory_space<vmem>>, %arg4: memref<656x128xf32, #tpu.memory_space<vmem>>) attributes {dimension_semantics = [#tpu.dimension_semantics<parallel>], iteration_bounds = array<i64: 4>, scalar_prefetch = 0 : i64, scratch_operands = 0 : i64, tpu.core_type = #tpu.core_type<tc>, window_params = [{transform_indices = @transform_0, window_bounds = array<i64: 656, 128>}, {pipeline_mode = #tpu.pipeline_mode<synchronous>, transform_indices = @transform_1, window_bounds = array<i64: 1, 128>}, {pipeline_mode = #tpu.pipeline_mode<synchronous>, transform_indices = @transform_2, window_bounds = array<i64: 1, 128>}, {transform_indices = @transform_3, window_bounds = array<i64: 656, 128>}]} {
    %c0 = arith.constant 0 : index
    %c0_0 = arith.constant 0 : index
    %0 = vector.load %arg1[%c0, %c0_0] : memref<656x128xbf16, #tpu.memory_space<vmem>>, vector<656x128xbf16>
    %1 = arith.extf %0 : vector<656x128xbf16> to vector<656x128xf32>
    %c0_1 = arith.constant 0 : index
    %c0_2 = arith.constant 0 : index
    %2 = vector.load %arg2[%c0_1, %c0_2] : memref<1x128xf32, #tpu.memory_space<vmem>>, vector<1x128xf32>
    %3 = vector.broadcast %2 : vector<1x128xf32> to vector<656x128xf32>
    %4 = arith.mulf %1, %3 : vector<656x128xf32>
    %c0_3 = arith.constant 0 : index
    %c0_4 = arith.constant 0 : index
    %5 = vector.load %arg3[%c0_3, %c0_4] : memref<1x128xf32, #tpu.memory_space<vmem>>, vector<1x128xf32>
    %6 = vector.broadcast %5 : vector<1x128xf32> to vector<656x128xf32>
    %7 = arith.addf %4, %6 : vector<656x128xf32>
    %cst = arith.constant 0.000000e+00 : f32
    %8 = vector.broadcast %cst : f32 to vector<656x128xf32>
    %9 = arith.cmpf oge, %7, %8 : vector<656x128xf32>
    %cst_5 = arith.constant 0.00999999977 : f32
    %10 = vector.broadcast %cst_5 : f32 to vector<656x128xf32>
    %11 = arith.mulf %10, %7 : vector<656x128xf32>
    %12 = arith.select %9, %7, %11 : vector<656x128xi1>, vector<656x128xf32>
    %c0_6 = arith.constant 0 : index
    %c0_7 = arith.constant 0 : index
    %13 = vector.load %arg4[%c0_6, %c0_7] : memref<656x128xf32, #tpu.memory_space<vmem>>, vector<656x128xf32>
    tpu.vector_store %arg4[%c0_6, %c0_7], %12 {strides = array<i32>} : memref<656x128xf32, #tpu.memory_space<vmem>>, vector<656x128xf32>,
    return
  }
  func.func @transform_0(%arg0: i32) -> (i32, i32) {
    %c0_i32 = arith.constant 0 : i32
    %c0_i32_0 = arith.constant 0 : i32
    return %arg0, %c0_i32 : i32, i32
  }
  func.func @transform_1(%arg0: i32) -> (i32, i32) {
    %c0_i32 = arith.constant 0 : i32
    %c0_i32_0 = arith.constant 0 : i32
    %c0_i32_1 = arith.constant 0 : i32
    return %c0_i32, %c0_i32_0 : i32, i32
  }
  func.func @transform_2(%arg0: i32) -> (i32, i32) {
    %c0_i32 = arith.constant 0 : i32
    %c0_i32_0 = arith.constant 0 : i32
    %c0_i32_1 = arith.constant 0 : i32
    return %c0_i32, %c0_i32_0 : i32, i32
  }
  func.func @transform_3(%arg0: i32) -> (i32, i32) {
    %c0_i32 = arith.constant 0 : i32
    %c0_i32_0 = arith.constant 0 : i32
    return %arg0, %c0_i32 : i32, i32
  }
}

</mosaic_0001>

<bundles_post_ra>
// kernel: decoder_forward.2
= control target key start
LH: loop header
LB: loop body
LE: loop exit
PB: predicated region body
PF: predicated region fallthrough
CT: control target
= control target key end

     0   :  { %s2552_s15 = smov 0   ;;  %s3173_s0 = inlined_call_operand.vmem [shape: bf16[2624,128], index: 0, kind: input, shape index: {}]   ;;  %s3174_s1 = inlined_call_operand.vmem [shape: bf16[128,128], index: 1, kind: input, shape index: {}]   ;;  %s3175_s2 = inlined_call_operand.vmem [shape: bf16[2624,128], index: 2, kind: output, shape index: {0}]   ;;  %s3176_s3 = inlined_call_operand.vmem [shape: f32[4,1,128], index: 3, kind: output, shape index: {1}]   ;;  %s3177_s4 = inlined_call_operand.vmem [shape: f32[4,1,128], index: 4, kind: output, shape index: {2}]  }
   0x1 LB: > { %s2558_s16 = sadd.s32 4294967295, %s2523_s15   ;;  %p1750_p0 = scmp.ge.s32.totalorder %s2523_s15, 1  ;;  %s2523_s15 = sphi %s2552_s15, %s15_s15  }
   0x2   : > { %p168_p1 = scmp.lt.s32.totalorder %s2523_s15, 5 }
   0x4   : > { %p169_p2 = pnand %p1750_p0, %p168_p1 }
   0x6   : > { %172 = sbr.rel (%p169_p2) target bundleno = 498 (0x1f2), region = 28 }
   0xb   : > { %v2468_v0 = vld [vmem:[%s3174_s1 + $0x38] sm:$0xff]   ;;  %v2525_v1 = vmov 0.0   ;;  %v2469_v2 = vld [vmem:[%s3174_s1 + $0x30] sm:$0xff]   ;;  %vm2526_vm0 = vmmov 0   ;;  %s200_s21 = smul.u32 82, %s2558_s16  ;;  %v2470_v3 = vld [vmem:[%s3174_s1 + $0x28] sm:$0xff]  }
   0xc   : > { %2262 = vmatprep.subr.bf16.mxu0 %v2525_v1  ;;  %2442 = vmatprep.subr.bf16.mxu1 %v2525_v1  ;;  %v2471_v4 = vld [vmem:[%s3174_s1 + $0x20] sm:$0xff]   ;;  %v2472_v5 = vld [vmem:[%s3174_s1 + $0x18] sm:$0xff]   ;;  %v2473_v6 = vld [vmem:[%s3174_s1 + $0x10] sm:$0xff]   ;;  %p212_p4 = scmp.lt.s32.totalorder %s2558_s16, 3 }
   0xd   : > { %2263 = vmatpush3.bf16.msra.mxu0 %v2468_v0  ;;  %2278 = vmatprep.mubr.msk.bf16.mxu0 %vm2526_vm0, %v2525_v1  ;;  %p201_p3 = scmp.lt.s32.totalorder %s200_s21, 327  ;;  %v2474_v7 = vld [vmem:[%s3174_s1 + $0x8] sm:$0xff]   ;;  %v2475_v8 = vld [vmem:[%s3174_s1] sm:$0xff]  }
   0xe   : > { %2264 = vmatprep.subr.bf16.mxu0 %v2525_v1  ;;  %2450 = vmatpush3.bf16.msra.mxu1 %v2468_v0  ;;  %s3185_s16 = smov (!%p212_p4, %s2558_s16), 3 }
   0xf   : > { %2443 = vmatprep.subr.bf16.mxu1 %v2525_v1  ;;  %2362 = vmatprep.mubr.msk.bf16.mxu1 %vm2526_vm0, %v2525_v1  ;;  %s3183_s21 = smov (!%p201_p3, %s200_s21), 327  ;;  %s214_s19 = scalar_lea.vmem %s3176_s3, %s3185_s16 }
  0x10   : > { %s1751_s24 = sshll.u32 %s3183_s21, 2  ;;  %s217_s22 = scalar_lea.vmem %s3177_s4, %s3185_s16 }
  0x11   : > { %2265 = vmatpush3.bf16.msra.mxu0 %v2469_v2  ;;  %s2590_s27 = scalar_lea.vmem %s3173_s0, %s1751_s24  ;;  %s2743_s14 = scalar_lea.vmem %s3175_s2, %s1751_s24 }
  0x12   : > { %2266 = vmatprep.subr.bf16.mxu0 %v2525_v1  ;;  %2451 = vmatpush3.bf16.msra.mxu1 %v2469_v2  ;;  %v2476_v9 = vld [vmem:[%s2590_s27] sm:$0xff]   ;;  %v2487_v10 = vld [vmem:[%s2590_s27 + $0xa8] sm:$0xff]   ;;  %v2489_v12 = vld [vmem:[%s2590_s27 + $0xb0] sm:$0xff]  }
  0x13   : > { %2444 = vmatprep.subr.bf16.mxu1 %v2525_v1  ;;  %v2477_v11 = vld [vmem:[%s2590_s27 + $0x8] sm:$0xff]   ;;  %v2478_v13 = vld [vmem:[%s2590_s27 + $0x10] sm:$0xff]   ;;  %v2491_v14 = vld [vmem:[%s2590_s27 + $0xb8] sm:$0xff]  }
  0x14   : > { %v2479_v15 = vld [vmem:[%s2590_s27 + $0x18] sm:$0xff]   ;;  %v2493_v16 = vld [vmem:[%s2590_s27 + $0xc0] sm:$0xff]   ;;  %v2495_v18 = vld [vmem:[%s2590_s27 + $0xc8] sm:$0xff]  }
  0x15   : > { %2267 = vmatpush3.bf16.msra.mxu0 %v2470_v3  ;;  %v2480_v17 = vld [vmem:[%s2590_s27 + $0x20] sm:$0xff]   ;;  %v2481_v19 = vld [vmem:[%s2590_s27 + $0x28] sm:$0xff]   ;;  %v2497_v20 = vld [vmem:[%s2590_s27 + $0xd0] sm:$0xff]  }
  0x16   : > { %2268 = vmatprep.subr.bf16.mxu0 %v2525_v1  ;;  %2452 = vmatpush3.bf16.msra.mxu1 %v2470_v3  ;;  %v2482_v21 = vld [vmem:[%s2590_s27 + $0x30] sm:$0xff]   ;;  %v2499_v22 = vld [vmem:[%s2590_s27 + $0xd8] sm:$0xff]   ;;  %v2501_v24 = vld [vmem:[%s2590_s27 + $0xe0] sm:$0xff]  }
  0x17   : > { %2445 = vmatprep.subr.bf16.mxu1 %v2525_v1  ;;  %v2483_v23 = vld [vmem:[%s2590_s27 + $0x38] sm:$0xff]   ;;  %v2484_v25 = vld [vmem:[%s2590_s27 + $0x40] sm:$0xff]   ;;  %v2503_v26 = vld [vmem:[%s2590_s27 + $0xe8] sm:$0xff]  }
  0x18   : > { %v2485_v27 = vld [vmem:[%s2590_s27 + $0x48] sm:$0xff]   ;;  %v2505_v28 = vld [vmem:[%s2590_s27 + $0xf0] sm:$0xff]   ;;  %v2507_v30 = vld [vmem:[%s2590_s27 + $0xf8] sm:$0xff]  }
  0x19   : > { %2269 = vmatpush3.bf16.msra.mxu0 %v2471_v4  ;;  %v2486_v29 = vld [vmem:[%s2590_s27 + $0x50] sm:$0xff]   ;;  %v2488_v31 = vld [vmem:[%s2590_s27 + $0x58] sm:$0xff]   ;;  %v2508_v32 = vld [vmem:[%s2590_s27 + $0x100] sm:$0xff]  }
  0x1a   : > { %2270 = vmatprep.subr.bf16.mxu0 %v2525_v1  ;;  %2453 = vmatpush3.bf16.msra.mxu1 %v2471_v4  ;;  %v2490_v33 = vld [vmem:[%s2590_s27 + $0x60] sm:$0xff]   ;;  %v2509_v34 = vld [vmem:[%s2590_s27 + $0x108] sm:$0xff]   ;;  %v2510_v36 = vld [vmem:[%s2590_s27 + $0x110] sm:$0xff]  }
  0x1b   : > { %2446 = vmatprep.subr.bf16.mxu1 %v2525_v1  ;;  %v2492_v35 = vld [vmem:[%s2590_s27 + $0x68] sm:$0xff]   ;;  %v2494_v37 = vld [vmem:[%s2590_s27 + $0x70] sm:$0xff]   ;;  %v2511_v38 = vld [vmem:[%s2590_s27 + $0x118] sm:$0xff]  }
  0x1c   : > { %v2496_v39 = vld [vmem:[%s2590_s27 + $0x78] sm:$0xff]   ;;  %v2512_v40 = vld [vmem:[%s2590_s27 + $0x120] sm:$0xff]   ;;  %v2513_v42 = vld [vmem:[%s2590_s27 + $0x128] sm:$0xff]  }
  0x1d   : > { %2271 = vmatpush3.bf16.msra.mxu0 %v2472_v5  ;;  %v2498_v41 = vld [vmem:[%s2590_s27 + $0x80] sm:$0xff]   ;;  %v2500_v43 = vld [vmem:[%s2590_s27 + $0x88] sm:$0xff]   ;;  %v2514_v44 = vld [vmem:[%s2590_s27 + $0x130] sm:$0xff]  }
  0x1e   : > { %2272 = vmatprep.subr.bf16.mxu0 %v2525_v1  ;;  %2454 = vmatpush3.bf16.msra.mxu1 %v2472_v5  ;;  %v2502_v45 = vld [vmem:[%s2590_s27 + $0x90] sm:$0xff]   ;;  %v2515_v46 = vld [vmem:[%s2590_s27 + $0x138] sm:$0xff]   ;;  %v2516_v48 = vld [vmem:[%s2590_s27 + $0x140] sm:$0xff]  }
  0x1f   : > { %2447 = vmatprep.subr.bf16.mxu1 %v2525_v1  ;;  %v2504_v47 = vld [vmem:[%s2590_s27 + $0x98] sm:$0xff]   ;;  %v2506_v49 = vld [vmem:[%s2590_s27 + $0xa0] sm:$0xff]  }
  0x21   : > { %2273 = vmatpush3.bf16.msra.mxu0 %v2473_v6 }
  0x22   : > { %2274 = vmatprep.subr.bf16.mxu0 %v2525_v1  ;;  %2455 = vmatpush3.bf16.msra.mxu1 %v2473_v6 }
  0x23   : > { %2448 = vmatprep.subr.bf16.mxu1 %v2525_v1 }
  0x25   : > { %2275 = vmatpush3.bf16.msra.mxu0 %v2474_v7 }
  0x26   : > { %2276 = vmatprep.subr.bf16.mxu0 %v2525_v1  ;;  %2456 = vmatpush3.bf16.msra.mxu1 %v2474_v7 }
  0x27   : > { %2449 = vmatprep.subr.bf16.mxu1 %v2525_v1 }
  0x29   : > { %2277 = vmatpush3.bf16.msra.mxu0 %v2475_v8 }
  0x2a   : > { %2457 = vmatpush3.bf16.msra.mxu1 %v2475_v8 }
  0x2c   : > { %2279 = vmatmul.mubr.bf16.vlgmr.msra.gmra.mxu0 %v2476_v9 }
  0x2d   : > { %2282 = vmatprep.mubr.msk.bf16.mxu0 %vm2526_vm0, %v2525_v1  ;;  %2363 = vmatmul.mubr.bf16.vlgmr.msra.gmra.mxu1 %v2487_v10 }
  0x2e   : > { %2366 = vmatprep.mubr.msk.bf16.mxu1 %vm2526_vm0, %v2525_v1 }
  0x34   : > { %2283 = vmatmul.mubr.bf16.gmra.mxu0 %v2477_v11 }
  0x35   : > { %2286 = vmatprep.mubr.msk.bf16.mxu0 %vm2526_vm0, %v2525_v1  ;;  %2367 = vmatmul.mubr.bf16.gmra.mxu1 %v2489_v12 }
  0x36   : > { %2370 = vmatprep.mubr.msk.bf16.mxu1 %vm2526_vm0, %v2525_v1 }
  0x3c   : > { %2287 = vmatmul.mubr.bf16.gmra.mxu0 %v2478_v13 }
  0x3d   : > { %2290 = vmatprep.mubr.msk.bf16.mxu0 %vm2526_vm0, %v2525_v1  ;;  %2371 = vmatmul.mubr.bf16.gmra.mxu1 %v2491_v14 }
  0x3e   : > { %2374 = vmatprep.mubr.msk.bf16.mxu1 %vm2526_vm0, %v2525_v1 }
  0x44   : > { %2291 = vmatmul.mubr.bf16.gmra.mxu0 %v2479_v15 }
  0x45   : > { %2294 = vmatprep.mubr.msk.bf16.mxu0 %vm2526_vm0, %v2525_v1  ;;  %2375 = vmatmul.mubr.bf16.gmra.mxu1 %v2493_v16 }
  0x46   : > { %2378 = vmatprep.mubr.msk.bf16.mxu1 %vm2526_vm0, %v2525_v1 }
  0x4c   : > { %2295 = vmatmul.mubr.bf16.gmra.mxu0 %v2480_v17 }
  0x4d   : > { %2298 = vmatprep.mubr.msk.bf16.mxu0 %vm2526_vm0, %v2525_v1  ;;  %2379 = vmatmul.mubr.bf16.gmra.mxu1 %v2495_v18 }
  0x4e   : > { %2382 = vmatprep.mubr.msk.bf16.mxu1 %vm2526_vm0, %v2525_v1 }
  0x54   : > { %2299 = vmatmul.mubr.bf16.gmra.mxu0 %v2481_v19 }
  0x55   : > { %2302 = vmatprep.mubr.msk.bf16.mxu0 %vm2526_vm0, %v2525_v1  ;;  %2383 = vmatmul.mubr.bf16.gmra.mxu1 %v2497_v20 }
  0x56   : > { %2386 = vmatprep.mubr.msk.bf16.mxu1 %vm2526_vm0, %v2525_v1 }
  0x5c   : > { %2303 = vmatmul.mubr.bf16.gmra.mxu0 %v2482_v21 }
  0x5d   : > { %2306 = vmatprep.mubr.msk.bf16.mxu0 %vm2526_vm0, %v2525_v1  ;;  %2387 = vmatmul.mubr.bf16.gmra.mxu1 %v2499_v22 }
  0x5e   : > { %2390 = vmatprep.mubr.msk.bf16.mxu1 %vm2526_vm0, %v2525_v1 }
  0x64   : > { %2307 = vmatmul.mubr.bf16.gmra.mxu0 %v2483_v23 }
  0x65   : > { %2310 = vmatprep.mubr.msk.bf16.mxu0 %vm2526_vm0, %v2525_v1  ;;  %2391 = vmatmul.mubr.bf16.gmra.mxu1 %v2501_v24 }
  0x66   : > { %2394 = vmatprep.mubr.msk.bf16.mxu1 %vm2526_vm0, %v2525_v1 }
  0x6c   : > { %2311 = vmatmul.mubr.bf16.gmra.mxu0 %v2484_v25 }
  0x6d   : > { %2314 = vmatprep.mubr.msk.bf16.mxu0 %vm2526_vm0, %v2525_v1  ;;  %2395 = vmatmul.mubr.bf16.gmra.mxu1 %v2503_v26 }
  0x6e   : > { %2398 = vmatprep.mubr.msk.bf16.mxu1 %vm2526_vm0, %v2525_v1 }
  0x74   : > { %2315 = vmatmul.mubr.bf16.gmra.mxu0 %v2485_v27 }
  0x75   : > { %2318 = vmatprep.mubr.msk.bf16.mxu0 %vm2526_vm0, %v2525_v1  ;;  %2399 = vmatmul.mubr.bf16.gmra.mxu1 %v2505_v28 }
  0x76   : > { %2402 = vmatprep.mubr.msk.bf16.mxu1 %vm2526_vm0, %v2525_v1 }
  0x7c   : > { %2319 = vmatmul.mubr.bf16.gmra.mxu0 %v2486_v29 }
  0x7d   : > { %2322 = vmatprep.mubr.msk.bf16.mxu0 %vm2526_vm0, %v2525_v1  ;;  %2403 = vmatmul.mubr.bf16.gmra.mxu1 %v2507_v30 }
  0x7e   : > { %2406 = vmatprep.mubr.msk.bf16.mxu1 %vm2526_vm0, %v2525_v1 }
  0x84   : > { %2323 = vmatmul.mubr.bf16.gmra.mxu0 %v2488_v31 }
  0x85   : > { %2326 = vmatprep.mubr.msk.bf16.mxu0 %vm2526_vm0, %v2525_v1  ;;  %2407 = vmatmul.mubr.bf16.gmra.mxu1 %v2508_v32 }
  0x86   : > { %2410 = vmatprep.mubr.msk.bf16.mxu1 %vm2526_vm0, %v2525_v1 }
  0x8c   : > { %2327 = vmatmul.mubr.bf16.gmra.mxu0 %v2490_v33 }
  0x8d   : > { %2330 = vmatprep.mubr.msk.bf16.mxu0 %vm2526_vm0, %v2525_v1  ;;  %2411 = vmatmul.mubr.bf16.gmra.mxu1 %v2509_v34 }
  0x8e   : > { %2414 = vmatprep.mubr.msk.bf16.mxu1 %vm2526_vm0, %v2525_v1 }
  0x94   : > { %2331 = vmatmul.mubr.bf16.gmra.mxu0 %v2492_v35 }
  0x95   : > { %2334 = vmatprep.mubr.msk.bf16.mxu0 %vm2526_vm0, %v2525_v1  ;;  %2415 = vmatmul.mubr.bf16.gmra.mxu1 %v2510_v36 }
  0x96   : > { %2418 = vmatprep.mubr.msk.bf16.mxu1 %vm2526_vm0, %v2525_v1 }
  0x9c   : > { %2335 = vmatmul.mubr.bf16.gmra.mxu0 %v2494_v37 }
  0x9d   : > { %2338 = vmatprep.mubr.msk.bf16.mxu0 %vm2526_vm0, %v2525_v1  ;;  %2419 = vmatmul.mubr.bf16.gmra.mxu1 %v2511_v38 }
  0x9e   : > { %2422 = vmatprep.mubr.msk.bf16.mxu1 %vm2526_vm0, %v2525_v1 }
  0xa4   : > { %2339 = vmatmul.mubr.bf16.gmra.mxu0 %v2496_v39 }
  0xa5   : > { %2342 = vmatprep.mubr.msk.bf16.mxu0 %vm2526_vm0, %v2525_v1  ;;  %2423 = vmatmul.mubr.bf16.gmra.mxu1 %v2512_v40 }
  0xa6   : > { %2426 = vmatprep.mubr.msk.bf16.mxu1 %vm2526_vm0, %v2525_v1 }
  0xac   : > { %2343 = vmatmul.mubr.bf16.gmra.mxu0 %v2498_v41 }
  0xad   : > { %2346 = vmatprep.mubr.msk.bf16.mxu0 %vm2526_vm0, %v2525_v1  ;;  %2427 = vmatmul.mubr.bf16.gmra.mxu1 %v2513_v42 }
  0xae   : > { %2430 = vmatprep.mubr.msk.bf16.mxu1 %vm2526_vm0, %v2525_v1 }
  0xb4   : > { %2347 = vmatmul.mubr.bf16.gmra.mxu0 %v2500_v43 }
  0xb5   : > { %2350 = vmatprep.mubr.msk.bf16.mxu0 %vm2526_vm0, %v2525_v1  ;;  %2431 = vmatmul.mubr.bf16.gmra.mxu1 %v2514_v44 }
  0xb6   : > { %2434 = vmatprep.mubr.msk.bf16.mxu1 %vm2526_vm0, %v2525_v1 }
  0xbc   : > { %2351 = vmatmul.mubr.bf16.gmra.mxu0 %v2502_v45 }
  0xbd   : > { %2354 = vmatprep.mubr.msk.bf16.mxu0 %vm2526_vm0, %v2525_v1  ;;  %2435 = vmatmul.mubr.bf16.gmra.mxu1 %v2515_v46 }
  0xbe   : > { %2438 = vmatprep.mubr.msk.bf16.mxu1 %vm2526_vm0, %v2525_v1 }
  0xc4   : > { %2355 = vmatmul.mubr.bf16.gmra.mxu0 %v2504_v47 }
  0xc5   : > { %2358 = vmatprep.mubr.msk.bf16.mxu0 %vm2526_vm0, %v2525_v1  ;;  %2439 = vmatmul.mubr.bf16.gmra.mxu1 %v2516_v48 }
  0xcc   : > { %2359 = vmatmul.mubr.bf16.gmra.mxu0 %v2506_v49 }
  0xec   : > { %v645_v50 = vpop.f32.mrf.mxu0 }
  0xed   : > { %v2736_v51 = vpop.f32.mrf.mxu1  ;;  %v1470_v55 = vmul.f32 %v645_v50, %v645_v50 }
  0xee   : > { %v2280_v52 = vpop.f32.mrf.mxu0 }
  0xef   : > { %v2364_v53 = vpop.f32.mrf.mxu1 }
  0xf0   : > { %v648_v54 = vpop.f32.mrf.mxu0 }
  0xf1   : > { %v1971_v56 = vpack.c.bf16 %v648_v54, %v645_v50  ;;  %v1382_v57 = vadd.f32 %v648_v54, %v645_v50  ;;  %v1471_v58 = vmul.f32 %v648_v54, %v648_v54  ;;  %v2745_v59 = vpop.f32.mrf.mxu1 }
  0xf2   : > { %v2281_v60 = vpop.f32.mrf.mxu0  ;;  %v2076_v61 = vpack.c.bf16 %v2745_v59, %v2736_v51 }
  0xf3   : > { %1972 = vst [vmem:[%s2743_s14] sm:$0xff] %v1971_v56   ;;  %v1552_v62 = vadd.f32 %v1471_v58, %v1470_v55  ;;  %v2365_v63 = vpop.f32.mrf.mxu1 }
  0xf4   : > { %v653_v0 = vpop.f32.mrf.mxu0  ;;  %2193 = vst [vmem:[%s2743_s14 + $0xa8] sm:$0xff] %v2076_v61  }
  0xf5   : > { %v1383_v1 = vadd.f32 %v1382_v57, %v653_v0  ;;  %v1472_v2 = vmul.f32 %v653_v0, %v653_v0  ;;  %v2751_v3 = vpop.f32.mrf.mxu1 }
  0xf6   : > { %v2284_v4 = vpop.f32.mrf.mxu0 }
  0xf7   : > { %v1553_v5 = vadd.f32 %v1552_v62, %v1472_v2  ;;  %v2368_v6 = vpop.f32.mrf.mxu1 }
  0xf8   : > { %v656_v7 = vpop.f32.mrf.mxu0 }
  0xf9   : > { %v1976_v8 = vpack.c.bf16 %v656_v7, %v653_v0  ;;  %v1384_v9 = vadd.f32 %v1383_v1, %v656_v7  ;;  %v1473_v10 = vmul.f32 %v656_v7, %v656_v7  ;;  %v2753_v11 = vpop.f32.mrf.mxu1 }
  0xfa   : > { %v2285_v12 = vpop.f32.mrf.mxu0  ;;  %v2081_v13 = vpack.c.bf16 %v2753_v11, %v2751_v3 }
  0xfb   : > { %2173 = vst [vmem:[%s2743_s14 + $0x8] sm:$0xff] %v1976_v8   ;;  %v1554_v14 = vadd.f32 %v1553_v5, %v1473_v10  ;;  %v2369_v15 = vpop.f32.mrf.mxu1 }
  0xfc   : > { %v661_v16 = vpop.f32.mrf.mxu0  ;;  %2194 = vst [vmem:[%s2743_s14 + $0xb0] sm:$0xff] %v2081_v13  }
  0xfd   : > { %v1385_v17 = vadd.f32 %v1384_v9, %v661_v16  ;;  %v1474_v18 = vmul.f32 %v661_v16, %v661_v16  ;;  %v2759_v19 = vpop.f32.mrf.mxu1 }
  0xfe   : > { %v2288_v20 = vpop.f32.mrf.mxu0 }
  0xff   : > { %v1555_v21 = vadd.f32 %v1554_v14, %v1474_v18  ;;  %v2372_v22 = vpop.f32.mrf.mxu1 }
 0x100   : > { %v664_v23 = vpop.f32.mrf.mxu0 }
 0x101   : > { %v1981_v24 = vpack.c.bf16 %v664_v23, %v661_v16  ;;  %v1386_v25 = vadd.f32 %v1385_v17, %v664_v23  ;;  %v1475_v26 = vmul.f32 %v664_v23, %v664_v23  ;;  %v2761_v27 = vpop.f32.mrf.mxu1 }
 0x102   : > { %v2289_v28 = vpop.f32.mrf.mxu0  ;;  %v2086_v29 = vpack.c.bf16 %v2761_v27, %v2759_v19 }
 0x103   : > { %2174 = vst [vmem:[%s2743_s14 + $0x10] sm:$0xff] %v1981_v24   ;;  %v1556_v30 = vadd.f32 %v1555_v21, %v1475_v26  ;;  %v2373_v31 = vpop.f32.mrf.mxu1 }
 0x104   : > { %v669_v32 = vpop.f32.mrf.mxu0  ;;  %2195 = vst [vmem:[%s2743_s14 + $0xb8] sm:$0xff] %v2086_v29  }
 0x105   : > { %v1387_v33 = vadd.f32 %v1386_v25, %v669_v32  ;;  %v1476_v34 = vmul.f32 %v669_v32, %v669_v32  ;;  %v2767_v35 = vpop.f32.mrf.mxu1 }
 0x106   : > { %v2292_v36 = vpop.f32.mrf.mxu0 }
 0x107   : > { %v1557_v37 = vadd.f32 %v1556_v30, %v1476_v34  ;;  %v2376_v38 = vpop.f32.mrf.mxu1 }
 0x108   : > { %v672_v39 = vpop.f32.mrf.mxu0 }
 0x109   : > { %v1986_v40 = vpack.c.bf16 %v672_v39, %v669_v32  ;;  %v1388_v41 = vadd.f32 %v1387_v33, %v672_v39  ;;  %v1477_v42 = vmul.f32 %v672_v39, %v672_v39  ;;  %v2769_v43 = vpop.f32.mrf.mxu1 }
 0x10a   : > { %v2293_v44 = vpop.f32.mrf.mxu0  ;;  %v2091_v45 = vpack.c.bf16 %v2769_v43, %v2767_v35 }
 0x10b   : > { %2175 = vst [vmem:[%s2743_s14 + $0x18] sm:$0xff] %v1986_v40   ;;  %v1558_v46 = vadd.f32 %v1557_v37, %v1477_v42  ;;  %v2377_v47 = vpop.f32.mrf.mxu1 }
 0x10c   : > { %v677_v48 = vpop.f32.mrf.mxu0  ;;  %2196 = vst [vmem:[%s2743_s14 + $0xc0] sm:$0xff] %v2091_v45  }
 0x10d   : > { %v1389_v49 = vadd.f32 %v1388_v41, %v677_v48  ;;  %v1478_v50 = vmul.f32 %v677_v48, %v677_v48  ;;  %v2775_v52 = vpop.f32.mrf.mxu1 }
 0x10e   : > { %v2296_v53 = vpop.f32.mrf.mxu0 }
 0x10f   : > { %v1559_v54 = vadd.f32 %v1558_v46, %v1478_v50  ;;  %v2380_v55 = vpop.f32.mrf.mxu1 }
 0x110   : > { %v680_v56 = vpop.f32.mrf.mxu0 }
 0x111   : > { %v1991_v57 = vpack.c.bf16 %v680_v56, %v677_v48  ;;  %v2777_v58 = vadd.f32 %v1389_v49, %v680_v56  ;;  %v1479_v60 = vmul.f32 %v680_v56, %v680_v56  ;;  %v2779_v61 = vpop.f32.mrf.mxu1 }
 0x112   : > { %v2297_v62 = vpop.f32.mrf.mxu0  ;;  %v2096_v63 = vpack.c.bf16 %v2779_v61, %v2775_v52 }
 0x113   : > { %2176 = vst [vmem:[%s2743_s14 + $0x20] sm:$0xff] %v1991_v57   ;;  %v2784_v0 = vadd.f32 %v1559_v54, %v1479_v60  ;;  %v2381_v1 = vpop.f32.mrf.mxu1 }
 0x114   : > { %v2786_v2 = vpop.f32.mrf.mxu0  ;;  %2197 = vst [vmem:[%s2743_s14 + $0xc8] sm:$0xff] %v2096_v63  }
 0x115   : > { %v2789_v4 = vpop.f32.mrf.mxu1 }
 0x116   : > { %v2300_v5 = vpop.f32.mrf.mxu0 }
 0x117   : > { %v2384_v6 = vpop.f32.mrf.mxu1 }
 0x118   : > { %v2791_v7 = vpop.f32.mrf.mxu0 }
 0x119   : > { %v1996_v8 = vpack.c.bf16 %v2791_v7, %v2786_v2  ;;  %v2795_v9 = vpop.f32.mrf.mxu1 }
 0x11a   : > { %v2301_v10 = vpop.f32.mrf.mxu0  ;;  %v2101_v12 = vpack.c.bf16 %v2795_v9, %v2789_v4 }
 0x11b   : > { %2177 = vst [vmem:[%s2743_s14 + $0x28] sm:$0xff] %v1996_v8   ;;  %v2385_v13 = vpop.f32.mrf.mxu1 }
 0x11c   : > { %v2800_v14 = vpop.f32.mrf.mxu0  ;;  %2198 = vst [vmem:[%s2743_s14 + $0xd0] sm:$0xff] %v2101_v12  }
 0x11d   : > { %v2803_v15 = vpop.f32.mrf.mxu1 }
 0x11e   : > { %v2304_v16 = vpop.f32.mrf.mxu0 }
 0x11f   : > { %v2388_v17 = vpop.f32.mrf.mxu1 }
 0x120   : > { %v2805_v18 = vpop.f32.mrf.mxu0 }
 0x121   : > { %v2001_v20 = vpack.c.bf16 %v2805_v18, %v2800_v14  ;;  %v2809_v21 = vpop.f32.mrf.mxu1 }
 0x122   : > { %v2305_v22 = vpop.f32.mrf.mxu0  ;;  %v2106_v23 = vpack.c.bf16 %v2809_v21, %v2803_v15 }
 0x123   : > { %2178 = vst [vmem:[%s2743_s14 + $0x30] sm:$0xff] %v2001_v20   ;;  %v2389_v24 = vpop.f32.mrf.mxu1 }
 0x124   : > { %v2814_v25 = vpop.f32.mrf.mxu0  ;;  %2199 = vst [vmem:[%s2743_s14 + $0xd8] sm:$0xff] %v2106_v23  }
 0x125   : > { %v2817_v26 = vpop.f32.mrf.mxu1 }
 0x126   : > { %v2308_v28 = vpop.f32.mrf.mxu0 }
 0x127   : > { %v2392_v29 = vpop.f32.mrf.mxu1 }
 0x128   : > { %v2819_v30 = vpop.f32.mrf.mxu0 }
 0x129   : > { %v2006_v31 = vpack.c.bf16 %v2819_v30, %v2814_v25  ;;  %v2823_v32 = vpop.f32.mrf.mxu1 }
 0x12a   : > { %v2309_v33 = vpop.f32.mrf.mxu0  ;;  %v2111_v34 = vpack.c.bf16 %v2823_v32, %v2817_v26 }
 0x12b   : > { %2179 = vst [vmem:[%s2743_s14 + $0x38] sm:$0xff] %v2006_v31   ;;  %v2393_v36 = vpop.f32.mrf.mxu1 }
 0x12c   : > { %v2828_v37 = vpop.f32.mrf.mxu0  ;;  %2200 = vst [vmem:[%s2743_s14 + $0xe0] sm:$0xff] %v2111_v34  }
 0x12d   : > { %v2831_v38 = vpop.f32.mrf.mxu1 }
 0x12e   : > { %v2312_v39 = vpop.f32.mrf.mxu0 }
 0x12f   : > { %v2396_v40 = vpop.f32.mrf.mxu1 }
 0x130   : > { %v2833_v41 = vpop.f32.mrf.mxu0 }
 0x131   : > { %v2011_v42 = vpack.c.bf16 %v2833_v41, %v2828_v37  ;;  %v2837_v44 = vpop.f32.mrf.mxu1 }
 0x132   : > { %v2313_v45 = vpop.f32.mrf.mxu0  ;;  %v2116_v46 = vpack.c.bf16 %v2837_v44, %v2831_v38 }
 0x133   : > { %2180 = vst [vmem:[%s2743_s14 + $0x40] sm:$0xff] %v2011_v42   ;;  %v2397_v47 = vpop.f32.mrf.mxu1 }
 0x134   : > { %v2842_v48 = vpop.f32.mrf.mxu0  ;;  %2201 = vst [vmem:[%s2743_s14 + $0xe8] sm:$0xff] %v2116_v46   ;;  %v1480_v47 = vmul.f32 %v2786_v2, %v2786_v2 }
 0x135   : > { %v2845_v49 = vpop.f32.mrf.mxu1 }
 0x136   : > { %v2316_v50 = vpop.f32.mrf.mxu0 }
 0x137   : > { %v2400_v53 = vpop.f32.mrf.mxu1 }
 0x138   : > { %v2847_v54 = vpop.f32.mrf.mxu0 }
 0x139   : > { %v2016_v55 = vpack.c.bf16 %v2847_v54, %v2842_v48  ;;  %v2851_v56 = vpop.f32.mrf.mxu1 }
 0x13a   : > { %v2317_v57 = vpop.f32.mrf.mxu0  ;;  %v2121_v60 = vpack.c.bf16 %v2851_v56, %v2845_v49 }
 0x13b   : > { %2181 = vst [vmem:[%s2743_s14 + $0x48] sm:$0xff] %v2016_v55   ;;  %v2401_v62 = vpop.f32.mrf.mxu1 }
 0x13c   : > { %v2856_v63 = vpop.f32.mrf.mxu0  ;;  %2202 = vst [vmem:[%s2743_s14 + $0xf0] sm:$0xff] %v2121_v60   ;;  %v1391_v60 = vadd.f32 %v2777_v58, %v2786_v2  ;;  %v1481_v62 = vmul.f32 %v2791_v7, %v2791_v7 }
 0x13d   : > { %v2859_v1 = vpop.f32.mrf.mxu1 }
 0x13e   : > { %v2320_v5 = vpop.f32.mrf.mxu0 }
 0x13f   : > { %v2404_v6 = vpop.f32.mrf.mxu1 }
 0x140   : > { %v2861_v8 = vpop.f32.mrf.mxu0 }
 0x141   : > { %v2021_v10 = vpack.c.bf16 %v2861_v8, %v2856_v63  ;;  %v2865_v12 = vpop.f32.mrf.mxu1 }
 0x142   : > { %v2321_v13 = vpop.f32.mrf.mxu0  ;;  %v2126_v16 = vpack.c.bf16 %v2865_v12, %v2859_v1 }
 0x143   : > { %2182 = vst [vmem:[%s2743_s14 + $0x50] sm:$0xff] %v2021_v10   ;;  %v2405_v17 = vpop.f32.mrf.mxu1  ;;  %v1561_v10 = vadd.f32 %v2784_v0, %v1480_v47  ;;  %v1392_v13 = vadd.f32 %v1391_v60, %v2791_v7 }
 0x144   : > { %v2870_v20 = vpop.f32.mrf.mxu0  ;;  %2203 = vst [vmem:[%s2743_s14 + $0xf8] sm:$0xff] %v2126_v16   ;;  %v1482_v16 = vmul.f32 %v2800_v14, %v2800_v14 }
 0x145   : > { %v2873_v22 = vpop.f32.mrf.mxu1  ;;  %v1562_v58 = vadd.f32 %v1561_v10, %v1481_v62  ;;  %v1393_v2 = vadd.f32 %v1392_v13, %v2800_v14 }
 0x146   : > { %v2324_v23 = vpop.f32.mrf.mxu0 }
 0x147   : > { %v2408_v24 = vpop.f32.mrf.mxu1  ;;  %v1563_v0 = vadd.f32 %v1562_v58, %v1482_v16  ;;  %v1394_v7 = vadd.f32 %v1393_v2, %v2805_v18 }
 0x148   : > { %v2875_v28 = vpop.f32.mrf.mxu0  ;;  %v1483_v24 = vmul.f32 %v2805_v18, %v2805_v18 }
 0x149   : > { %v2026_v29 = vpack.c.bf16 %v2875_v28, %v2870_v20  ;;  %v2879_v31 = vpop.f32.mrf.mxu1 }
 0x14a   : > { %v2325_v33 = vpop.f32.mrf.mxu0  ;;  %v2131_v34 = vpack.c.bf16 %v2879_v31, %v2873_v22  ;;  %v1564_v47 = vadd.f32 %v1563_v0, %v1483_v24 }
 0x14b   : > { %2183 = vst [vmem:[%s2743_s14 + $0x58] sm:$0xff] %v2026_v29   ;;  %v2409_v36 = vpop.f32.mrf.mxu1 }
 0x14c   : > { %v2884_v39 = vpop.f32.mrf.mxu0  ;;  %2204 = vst [vmem:[%s2743_s14 + $0x100] sm:$0xff] %v2131_v34   ;;  %v1484_v34 = vmul.f32 %v2814_v25, %v2814_v25 }
 0x14d   : > { %v2887_v40 = vpop.f32.mrf.mxu1 }
 0x14e   : > { %v2328_v42 = vpop.f32.mrf.mxu0  ;;  %v1565_v60 = vadd.f32 %v1564_v47, %v1484_v34 }
 0x14f   : > { %v2412_v45 = vpop.f32.mrf.mxu1 }
 0x150   : > { %v2889_v46 = vpop.f32.mrf.mxu0 }
 0x151   : > { %v2031_v50 = vpack.c.bf16 %v2889_v46, %v2884_v39  ;;  %v2895_v53 = vpop.f32.mrf.mxu1 }
 0x152   : > { %v2329_v55 = vpop.f32.mrf.mxu0  ;;  %v2136_v57 = vpack.c.bf16 %v2895_v53, %v2887_v40 }
 0x153   : > { %2184 = vst [vmem:[%s2743_s14 + $0x60] sm:$0xff] %v2031_v50   ;;  %v2413_v5 = vpop.f32.mrf.mxu1  ;;  %v1395_v50 = vadd.f32 %v1394_v7, %v2814_v25  ;;  %v1485_v55 = vmul.f32 %v2819_v30, %v2819_v30 }
 0x154   : > { %v2904_v6 = vpop.f32.mrf.mxu0  ;;  %2205 = vst [vmem:[%s2743_s14 + $0x108] sm:$0xff] %v2136_v57   ;;  %v1486_v5 = vmul.f32 %v2828_v37, %v2828_v37 }
 0x155   : > { %v2911_v17 = vpop.f32.mrf.mxu1  ;;  %v1396_v62 = vadd.f32 %v1395_v50, %v2819_v30  ;;  %v1566_v16 = vadd.f32 %v1565_v60, %v1485_v55 }
 0x156   : > { %v2332_v23 = vpop.f32.mrf.mxu0 }
 0x157   : > { %v2416_v29 = vpop.f32.mrf.mxu1  ;;  %v1397_v25 = vadd.f32 %v1396_v62, %v2828_v37  ;;  %v1487_v23 = vmul.f32 %v2833_v41, %v2833_v41  ;;  %v1567_v24 = vadd.f32 %v1566_v16, %v1486_v5 }
 0x158   : > { %v2916_v33 = vpop.f32.mrf.mxu0  ;;  %v1488_v29 = vmul.f32 %v2842_v48, %v2842_v48 }
 0x159   : > { %v2036_v36 = vpack.c.bf16 %v2916_v33, %v2904_v6  ;;  %v2923_v42 = vpop.f32.mrf.mxu1  ;;  %v1398_v30 = vadd.f32 %v1397_v25, %v2833_v41 }
 0x15a   : > { %v2333_v45 = vpop.f32.mrf.mxu0  ;;  %v2141_v14 = vpack.c.bf16 %v2923_v42, %v2911_v17 }
 0x15b   : > { %2185 = vst [vmem:[%s2743_s14 + $0x68] sm:$0xff] %v2036_v36   ;;  %v2417_v18 = vpop.f32.mrf.mxu1  ;;  %v1568_v36 = vadd.f32 %v1567_v24, %v1487_v23  ;;  %v1399_v45 = vadd.f32 %v1398_v30, %v2842_v48 }
 0x15c   : > { %v2931_v57 = vpop.f32.mrf.mxu0  ;;  %2206 = vst [vmem:[%s2743_s14 + $0x110] sm:$0xff] %v2141_v14   ;;  %v1489_v14 = vmul.f32 %v2847_v54, %v2847_v54  ;;  %v1490_v18 = vmul.f32 %v2856_v63, %v2856_v63 }
 0x15d   : > { %v2937_v10 = vpop.f32.mrf.mxu1  ;;  %v1569_v50 = vadd.f32 %v1568_v36, %v1488_v29  ;;  %v1400_v55 = vadd.f32 %v1399_v45, %v2847_v54 }
 0x15e   : > { %v2336_v13 = vpop.f32.mrf.mxu0 }
 0x15f   : > { %v2420_v58 = vpop.f32.mrf.mxu1  ;;  %v1570_v5 = vadd.f32 %v1569_v50, %v1489_v14  ;;  %v1401_v48 = vadd.f32 %v1400_v55, %v2856_v63  ;;  %v1491_v13 = vmul.f32 %v2861_v8, %v2861_v8 }
 0x160   : > { %v2942_v2 = vpop.f32.mrf.mxu0  ;;  %v1492_v58 = vmul.f32 %v2870_v20, %v2870_v20 }
 0x161   : > { %v2041_v0 = vpack.c.bf16 %v2942_v2, %v2931_v57  ;;  %v2949_v7 = vpop.f32.mrf.mxu1  ;;  %v1571_v23 = vadd.f32 %v1570_v5, %v1490_v18  ;;  %v1402_v54 = vadd.f32 %v1401_v48, %v2861_v8 }
 0x162   : > { %v2337_v34 = vpop.f32.mrf.mxu0  ;;  %v2146_v37 = vpack.c.bf16 %v2949_v7, %v2937_v10 }
 0x163   : > { %2186 = vst [vmem:[%s2743_s14 + $0x70] sm:$0xff] %v2041_v0   ;;  %v2421_v41 = vpop.f32.mrf.mxu1  ;;  %v1572_v0 = vadd.f32 %v1571_v23, %v1491_v13  ;;  %v1403_v34 = vadd.f32 %v1402_v54, %v2870_v20 }
 0x164   : > { %v2957_v47 = vpop.f32.mrf.mxu0  ;;  %2207 = vst [vmem:[%s2743_s14 + $0x118] sm:$0xff] %v2146_v37   ;;  %v1493_v37 = vmul.f32 %v2875_v28, %v2875_v28  ;;  %v1494_v41 = vmul.f32 %v2884_v39, %v2884_v39 }
 0x165   : > { %v2963_v60 = vpop.f32.mrf.mxu1  ;;  %v1573_v45 = vadd.f32 %v1572_v0, %v1492_v58  ;;  %v1404_v14 = vadd.f32 %v1403_v34, %v2875_v28  ;;  %v1496_v28 = vmul.f32 %v2904_v6, %v2904_v6 }
 0x166   : > { %v2340_v62 = vpop.f32.mrf.mxu0 }
 0x167   : > { %v2424_v16 = vpop.f32.mrf.mxu1  ;;  %v1574_v18 = vadd.f32 %v1573_v45, %v1493_v37  ;;  %v1405_v20 = vadd.f32 %v1404_v14, %v2884_v39  ;;  %v1495_v62 = vmul.f32 %v2889_v46, %v2889_v46 }
 0x168   : > { %v2968_v25 = vpop.f32.mrf.mxu0 }
 0x169   : > { %v2046_v24 = vpack.c.bf16 %v2968_v25, %v2957_v47  ;;  %v2975_v30 = vpop.f32.mrf.mxu1  ;;  %v1575_v13 = vadd.f32 %v1574_v18, %v1494_v41  ;;  %v1406_v16 = vadd.f32 %v1405_v20, %v2889_v46 }
 0x16a   : > { %v2341_v29 = vpop.f32.mrf.mxu0  ;;  %v2151_v63 = vpack.c.bf16 %v2975_v30, %v2963_v60 }
 0x16b   : > { %2187 = vst [vmem:[%s2743_s14 + $0x78] sm:$0xff] %v2046_v24   ;;  %v2425_v8 = vpop.f32.mrf.mxu1  ;;  %v1576_v39 = vadd.f32 %v1575_v13, %v1495_v62  ;;  %v1407_v29 = vadd.f32 %v1406_v16, %v2904_v6 }
 0x16c   : > { %v773_v36 = vpop.f32.mrf.mxu0  ;;  %2208 = vst [vmem:[%s2743_s14 + $0x120] sm:$0xff] %v2151_v63   ;;  %v1497_v63 = vmul.f32 %v2916_v33, %v2916_v33  ;;  %v1498_v8 = vmul.f32 %v2931_v57, %v2931_v57 }
 0x16d   : > { %v2987_v50 = vpop.f32.mrf.mxu1  ;;  %v1577_v46 = vadd.f32 %v1576_v39, %v1496_v28  ;;  %v1408_v37 = vadd.f32 %v1407_v29, %v2916_v33  ;;  %v1500_v33 = vmul.f32 %v2957_v47, %v2957_v47 }
 0x16e   : > { %v2344_v55 = vpop.f32.mrf.mxu0 }
 0x16f   : > { %v2428_v5 = vpop.f32.mrf.mxu1  ;;  %v1578_v41 = vadd.f32 %v1577_v46, %v1497_v63  ;;  %v1409_v6 = vadd.f32 %v1408_v37, %v2931_v57  ;;  %v1499_v55 = vmul.f32 %v2942_v2, %v2942_v2 }
 0x170   : > { %v776_v48 = vpop.f32.mrf.mxu0 }
 0x171   : > { %v2051_v23 = vpack.c.bf16 %v776_v48, %v773_v36  ;;  %v2995_v54 = vpop.f32.mrf.mxu1  ;;  %v1579_v62 = vadd.f32 %v1578_v41, %v1498_v8  ;;  %v1410_v5 = vadd.f32 %v1409_v6, %v2942_v2  ;;  %v1503_v41 = vmul.f32 %v776_v48, %v776_v48 }
 0x172   : > { %v2345_v58 = vpop.f32.mrf.mxu0  ;;  %v2156_v24 = vpack.c.bf16 %v2995_v54, %v2987_v50 }
 0x173   : > { %2188 = vst [vmem:[%s2743_s14 + $0x80] sm:$0xff] %v2051_v23   ;;  %v2429_v0 = vpop.f32.mrf.mxu1  ;;  %v1580_v57 = vadd.f32 %v1579_v62, %v1499_v55  ;;  %v1411_v58 = vadd.f32 %v1410_v5, %v2957_v47 }
 0x174   : > { %v781_v34 = vpop.f32.mrf.mxu0  ;;  %2209 = vst [vmem:[%s2743_s14 + $0x128] sm:$0xff] %v2156_v24   ;;  %v1501_v24 = vmul.f32 %v2968_v25, %v2968_v25  ;;  %v1502_v0 = vmul.f32 %v773_v36, %v773_v36 }
 0x175   : > { %v3007_v45 = vpop.f32.mrf.mxu1  ;;  %v1581_v2 = vadd.f32 %v1580_v57, %v1500_v33  ;;  %v1412_v63 = vadd.f32 %v1411_v58, %v2968_v25  ;;  %v1504_v62 = vmul.f32 %v781_v34, %v781_v34 }
 0x176   : > { %v2348_v14 = vpop.f32.mrf.mxu0 }
 0x177   : > { %v2432_v18 = vpop.f32.mrf.mxu1  ;;  %v1582_v8 = vadd.f32 %v1581_v2, %v1501_v24  ;;  %v1413_v14 = vadd.f32 %v1412_v63, %v773_v36 }
 0x178   : > { %v784_v20 = vpop.f32.mrf.mxu0 }
 0x179   : > { %v2056_v13 = vpack.c.bf16 %v784_v20, %v781_v34  ;;  %v3015_v16 = vpop.f32.mrf.mxu1  ;;  %v1583_v55 = vadd.f32 %v1582_v8, %v1502_v0  ;;  %v1414_v18 = vadd.f32 %v1413_v14, %v776_v48  ;;  %v1505_v57 = vmul.f32 %v784_v20, %v784_v20 }
 0x17a   : > { %v2349_v28 = vpop.f32.mrf.mxu0  ;;  %v2161_v23 = vpack.c.bf16 %v3015_v16, %v3007_v45 }
 0x17b   : > { %2189 = vst [vmem:[%s2743_s14 + $0x88] sm:$0xff] %v2056_v13   ;;  %v2433_v39 = vpop.f32.mrf.mxu1  ;;  %v1584_v28 = vadd.f32 %v1583_v55, %v1503_v41 }
 0x17c   : > { %v789_v29 = vpop.f32.mrf.mxu0  ;;  %2210 = vst [vmem:[%s2743_s14 + $0x130] sm:$0xff] %v2161_v23   ;;  %v1415_v23 = vadd.f32 %v1414_v18, %v781_v34 }
 0x17d   : > { %v3025_v46 = vpop.f32.mrf.mxu1  ;;  %v1585_v24 = vadd.f32 %v1584_v28, %v1504_v62  ;;  %v1506_v2 = vmul.f32 %v789_v29, %v789_v29 }
 0x17e   : > { %v2352_v37 = vpop.f32.mrf.mxu0  ;;  %v1416_v39 = vadd.f32 %v1415_v23, %v784_v20 }
 0x17f   : > { %v2436_v47 = vpop.f32.mrf.mxu1  ;;  %v1586_v0 = vadd.f32 %v1585_v24, %v1505_v57 }
 0x180   : > { %v792_v6 = vpop.f32.mrf.mxu0  ;;  %v1417_v37 = vadd.f32 %v1416_v39, %v789_v29 }
 0x181   : > { %v2061_v5 = vpack.c.bf16 %v792_v6, %v789_v29  ;;  %v3027_v13 = vpop.f32.mrf.mxu1  ;;  %v1507_v8 = vmul.f32 %v792_v6, %v792_v6  ;;  %v1587_v41 = vadd.f32 %v1586_v0, %v1506_v2 }
 0x182   : > { %v2353_v33 = vpop.f32.mrf.mxu0  ;;  %v2166_v25 = vpack.c.bf16 %v3027_v13, %v3025_v46  ;;  %v1418_v34 = vadd.f32 %v1417_v37, %v792_v6 }
 0x183   : > { %2190 = vst [vmem:[%s2743_s14 + $0x90] sm:$0xff] %v2061_v5   ;;  %v2437_v58 = vpop.f32.mrf.mxu1  ;;  %v1588_v62 = vadd.f32 %v1587_v41, %v1507_v8 }
 0x184   : > { %v797_v36 = vpop.f32.mrf.mxu0  ;;  %2211 = vst [vmem:[%s2743_s14 + $0x138] sm:$0xff] %v2166_v25  }
 0x185   : > { %v3033_v63 = vpop.f32.mrf.mxu1  ;;  %v1508_v55 = vmul.f32 %v797_v36, %v797_v36  ;;  %v1419_v25 = vadd.f32 %v1418_v34, %v797_v36 }
 0x186   : > { %v2356_v48 = vpop.f32.mrf.mxu0 }
 0x187   : > { %v2440_v14 = vpop.f32.mrf.mxu1  ;;  %v1589_v57 = vadd.f32 %v1588_v62, %v1508_v55 }
 0x188   : > { %v800_v47 = vpop.f32.mrf.mxu0 }
 0x189   : > { %v2066_v18 = vpack.c.bf16 %v800_v47, %v797_v36  ;;  %v3035_v5 = vpop.f32.mrf.mxu1  ;;  %v1509_v28 = vmul.f32 %v800_v47, %v800_v47  ;;  %v1420_v58 = vadd.f32 %v1419_v25, %v800_v47  ;;  %v1512_v36 = vmul.f32 %v2736_v51, %v2736_v51 }
 0x18a   : > { %3180 = vst [vmem:[#allocation2_spill] sm:$0xff] %v3035_v5  ;;  %v2357_v33 = vpop.f32.mrf.mxu0  ;;  %v2171_v20 = vpack.c.bf16 %v3035_v5, %v3033_v63  ;;  %v1513_v47 = vmul.f32 %v2745_v59, %v2745_v59 }
 0x18b   : > { %2191 = vst [vmem:[%s2743_s14 + $0x98] sm:$0xff] %v2066_v18   ;;  %v2441_v23 = vpop.f32.mrf.mxu1  ;;  %v1590_v39 = vadd.f32 %v1589_v57, %v1509_v28  ;;  %v1514_v18 = vmul.f32 %v2751_v3, %v2751_v3 }
 0x18c   : > { %v805_v29 = vpop.f32.mrf.mxu0  ;;  %2212 = vst [vmem:[%s2743_s14 + $0x140] sm:$0xff] %v2171_v20  }
 0x18d   : > { %v1510_v24 = vmul.f32 %v805_v29, %v805_v29  ;;  %v1421_v2 = vadd.f32 %v1420_v58, %v805_v29 }
 0x18e   : > { %v2360_v6 = vpop.f32.mrf.mxu0 }
 0x18f   : > { %v1591_v0 = vadd.f32 %v1590_v39, %v1510_v24 }
 0x190   : > { %v808_v48 = vpop.f32.mrf.mxu0 }
 0x191   : > { %v2071_v37 = vpack.c.bf16 %v808_v48, %v805_v29  ;;  %v1422_v14 = vadd.f32 %v1421_v2, %v808_v48  ;;  %v1511_v33 = vmul.f32 %v808_v48, %v808_v48 }
 0x192   : > { %v2361_v5 = vpop.f32.mrf.mxu0 }
 0x193   : > { %2192 = vst [vmem:[%s2743_s14 + $0xa0] sm:$0xff] %v2071_v37   ;;  %v1423_v8 = vadd.f32 %v1422_v14, %v2736_v51  ;;  %v1592_v41 = vadd.f32 %v1591_v0, %v1511_v33  ;;  %v1515_v5 = vmul.f32 %v2753_v11, %v2753_v11  ;;  %v1516_v51 = vmul.f32 %v2759_v19, %v2759_v19 }
 0x195   : > { %v1424_v34 = vadd.f32 %v1423_v8, %v2745_v59  ;;  %v1593_v55 = vadd.f32 %v1592_v41, %v1512_v36  ;;  %v1517_v59 = vmul.f32 %v2761_v27, %v2761_v27 }
 0x197   : > { %v1425_v20 = vadd.f32 %v1424_v34, %v2751_v3  ;;  %v1594_v62 = vadd.f32 %v1593_v55, %v1513_v47  ;;  %v1518_v3 = vmul.f32 %v2767_v35, %v2767_v35 }
 0x199   : > { %v1426_v25 = vadd.f32 %v1425_v20, %v2753_v11  ;;  %v1595_v28 = vadd.f32 %v1594_v62, %v1514_v18  ;;  %v1519_v11 = vmul.f32 %v2769_v43, %v2769_v43 }
 0x19b   : > { %v1427_v23 = vadd.f32 %v1426_v25, %v2759_v19  ;;  %v1596_v29 = vadd.f32 %v1595_v28, %v1515_v5  ;;  %v1520_v19 = vmul.f32 %v2775_v52, %v2775_v52 }
 0x19d   : > { %v1428_v57 = vadd.f32 %v1427_v23, %v2761_v27  ;;  %v1597_v58 = vadd.f32 %v1596_v29, %v1516_v51  ;;  %v1521_v27 = vmul.f32 %v2779_v61, %v2779_v61 }
 0x19f   : > { %v1429_v24 = vadd.f32 %v1428_v57, %v2767_v35  ;;  %v1598_v6 = vadd.f32 %v1597_v58, %v1517_v59  ;;  %v1522_v35 = vmul.f32 %v2789_v4, %v2789_v4 }
 0x1a1   : > { %v1430_v39 = vadd.f32 %v1429_v24, %v2769_v43  ;;  %v1599_v2 = vadd.f32 %v1598_v6, %v1518_v3  ;;  %v1523_v43 = vmul.f32 %v2795_v9, %v2795_v9 }
 0x1a3   : > { %v1431_v48 = vadd.f32 %v1430_v39, %v2775_v52  ;;  %v1600_v0 = vadd.f32 %v1599_v2, %v1519_v11  ;;  %v1524_v52 = vmul.f32 %v2803_v15, %v2803_v15  ;;  %v1533_v11 = vmul.f32 %v2865_v12, %v2865_v12 }
 0x1a5   : > { %v1432_v37 = vadd.f32 %v1431_v48, %v2779_v61  ;;  %v1601_v14 = vadd.f32 %v1600_v0, %v1520_v19  ;;  %v1525_v61 = vmul.f32 %v2809_v21, %v2809_v21  ;;  %v1534_v19 = vmul.f32 %v2873_v22, %v2873_v22 }
 0x1a6   : > { %v1535_v0 = vmul.f32 %v2879_v31, %v2879_v31 }
 0x1a7   : > { %v1602_v33 = vadd.f32 %v1601_v14, %v1521_v27  ;;  %v1433_v36 = vadd.f32 %v1432_v37, %v2789_v4  ;;  %v1526_v4 = vmul.f32 %v2817_v26, %v2817_v26  ;;  %v1536_v37 = vmul.f32 %v2887_v40, %v2887_v40 }
 0x1a9   : > { %v1434_v8 = vadd.f32 %v1433_v36, %v2795_v9  ;;  %v1603_v41 = vadd.f32 %v1602_v33, %v1522_v35  ;;  %v1527_v9 = vmul.f32 %v2823_v32, %v2823_v32  ;;  %v1537_v35 = vmul.f32 %v2895_v53, %v2895_v53 }
 0x1aa   : > { %v1538_v36 = vmul.f32 %v2911_v17, %v2911_v17 }
 0x1ab   : > { %v1435_v47 = vadd.f32 %v1434_v8, %v2803_v15  ;;  %v1604_v34 = vadd.f32 %v1603_v41, %v1523_v43  ;;  %v1528_v15 = vmul.f32 %v2831_v38, %v2831_v38  ;;  %v1539_v8 = vmul.f32 %v2923_v42, %v2923_v42 }
 0x1ad   : > { %v1436_v55 = vadd.f32 %v1435_v47, %v2809_v21  ;;  %v1605_v18 = vadd.f32 %v1604_v34, %v1524_v52  ;;  %v1529_v21 = vmul.f32 %v2837_v44, %v2837_v44  ;;  %v1540_v52 = vmul.f32 %v2937_v10, %v2937_v10 }
 0x1ae   : > { %v1541_v34 = vmul.f32 %v2949_v7, %v2949_v7 }
 0x1af   : > { %v1437_v20 = vadd.f32 %v1436_v55, %v2817_v26  ;;  %v1606_v62 = vadd.f32 %v1605_v18, %v1525_v61  ;;  %v1530_v26 = vmul.f32 %v2845_v49, %v2845_v49  ;;  %v1542_v55 = vmul.f32 %v2963_v60, %v2963_v60 }
 0x1b1   : > { %v1438_v5 = vadd.f32 %v1437_v20, %v2823_v32  ;;  %v1607_v25 = vadd.f32 %v1606_v62, %v1526_v4  ;;  %v1531_v32 = vmul.f32 %v2851_v56, %v2851_v56  ;;  %v1543_v4 = vmul.f32 %v2975_v30, %v2975_v30 }
 0x1b2   : > { %v1544_v62 = vmul.f32 %v2987_v50, %v2987_v50 }
 0x1b3   : > { %v1439_v28 = vadd.f32 %v1438_v5, %v2831_v38  ;;  %v1608_v51 = vadd.f32 %v1607_v25, %v1527_v9  ;;  %v1532_v38 = vmul.f32 %v2859_v1, %v2859_v1  ;;  %v1545_v5 = vmul.f32 %v2995_v54, %v2995_v54 }
 0x1b5   : > { %v1440_v23 = vadd.f32 %v1439_v28, %v2837_v44  ;;  %v1609_v29 = vadd.f32 %v1608_v51, %v1528_v15  ;;  %v1546_v15 = vmul.f32 %v3007_v45, %v3007_v45  ;;  %v1547_v51 = vmul.f32 %v3015_v16, %v3015_v16 }
 0x1b7   : > { %v1441_v59 = vadd.f32 %v1440_v23, %v2845_v49  ;;  %v1610_v57 = vadd.f32 %v1609_v29, %v1529_v21  ;;  %v1548_v23 = vmul.f32 %v3025_v46, %v3025_v46 }
 0x1b9   : > { %v1442_v58 = vadd.f32 %v1441_v59, %v2851_v56  ;;  %v1611_v3 = vadd.f32 %v1610_v57, %v1530_v26  ;;  %v1550_v57 = vmul.f32 %v3033_v63, %v3033_v63 }
 0x1bb   : > { %v1443_v24 = vadd.f32 %v1442_v58, %v2859_v1  ;;  %v1612_v6 = vadd.f32 %v1611_v3, %v1531_v32  ;;  %v3181_v32 = vld [vmem:[#allocation2_spill] sm:$0xff] }
 0x1bc   : > { %v1551_v3 = vmul.f32 %v3181_v32, %v3181_v32 }
 0x1bd   : > { %v1444_v44 = vadd.f32 %v1443_v24, %v2865_v12  ;;  %v1613_v39 = vadd.f32 %v1612_v6, %v1532_v38 }
 0x1bf   : > { %v1614_v49 = vadd.f32 %v1613_v39, %v1533_v11  ;;  %v1445_v2 = vadd.f32 %v1444_v44, %v2873_v22 }
 0x1c1   : > { %v1615_v56 = vadd.f32 %v1614_v49, %v1534_v19  ;;  %v1446_v48 = vadd.f32 %v1445_v2, %v2879_v31 }
 0x1c3   : > { %v1616_v1 = vadd.f32 %v1615_v56, %v1535_v0  ;;  %v1447_v27 = vadd.f32 %v1446_v48, %v2887_v40 }
 0x1c5   : > { %v1617_v12 = vadd.f32 %v1616_v1, %v1536_v37  ;;  %v1448_v14 = vadd.f32 %v1447_v27, %v2895_v53 }
 0x1c7   : > { %v1618_v33 = vadd.f32 %v1617_v12, %v1537_v35  ;;  %v1449_v22 = vadd.f32 %v1448_v14, %v2911_v17 }
 0x1c9   : > { %v1619_v43 = vadd.f32 %v1618_v33, %v1538_v36  ;;  %v1450_v31 = vadd.f32 %v1449_v22, %v2923_v42 }
 0x1cb   : > { %v1620_v41 = vadd.f32 %v1619_v43, %v1539_v8  ;;  %v1451_v40 = vadd.f32 %v1450_v31, %v2937_v10 }
 0x1cd   : > { %v1621_v47 = vadd.f32 %v1620_v41, %v1540_v52  ;;  %v1452_v53 = vadd.f32 %v1451_v40, %v2949_v7 }
 0x1cf   : > { %v1622_v61 = vadd.f32 %v1621_v47, %v1541_v34  ;;  %v1453_v17 = vadd.f32 %v1452_v53, %v2963_v60 }
 0x1d1   : > { %v1623_v18 = vadd.f32 %v1622_v61, %v1542_v55  ;;  %v1454_v42 = vadd.f32 %v1453_v17, %v2975_v30 }
 0x1d3   : > { %v1624_v20 = vadd.f32 %v1623_v18, %v1543_v4  ;;  %v1455_v10 = vadd.f32 %v1454_v42, %v2987_v50 }
 0x1d5   : > { %v1625_v9 = vadd.f32 %v1624_v20, %v1544_v62  ;;  %v1456_v7 = vadd.f32 %v1455_v10, %v2995_v54 }
 0x1d7   : > { %v1626_v25 = vadd.f32 %v1625_v9, %v1545_v5  ;;  %v1457_v60 = vadd.f32 %v1456_v7, %v3007_v45  ;;  %v1549_v45 = vmul.f32 %v3027_v13, %v3027_v13 }
 0x1d9   : > { %v1627_v28 = vadd.f32 %v1626_v25, %v1546_v15  ;;  %v1458_v30 = vadd.f32 %v1457_v60, %v3015_v16 }
 0x1db   : > { %v1628_v50 = vadd.f32 %v1627_v28, %v1547_v51  ;;  %v1459_v21 = vadd.f32 %v1458_v30, %v3025_v46 }
 0x1dd   : > { %v1629_v54 = vadd.f32 %v1628_v50, %v1548_v23  ;;  %v1460_v29 = vadd.f32 %v1459_v21, %v3027_v13 }
 0x1df   : > { %v1630_v26 = vadd.f32 %v1629_v54, %v1549_v45  ;;  %v1461_v59 = vadd.f32 %v1460_v29, %v3033_v63 }
 0x1e1   : > { %v1631_v16 = vadd.f32 %v1630_v26, %v1550_v57  ;;  %v1462_v58 = vadd.f32 %v1461_v59, %v3181_v32 }
 0x1e3   : > { %v1463_v46 = vrot.slane %v1462_v58, 4  ;;  %v1632_v38 = vadd.f32 %v1631_v16, %v1551_v3 }
 0x1e5   : > { %v1464_v24 = vadd.f32 %v1463_v46, %v1462_v58  ;;  %v1633_v6 = vrot.slane %v1632_v38, 4 }
 0x1e7   : > { %v1465_v44 = vrot.slane %v1464_v24, 2  ;;  %v1634_v11 = vadd.f32 %v1633_v6, %v1632_v38 }
 0x1e9   : > { %v1466_v13 = vadd.f32 %v1465_v44, %v1464_v24  ;;  %v1635_v39 = vrot.slane %v1634_v11, 2 }
 0x1eb   : > { %v1467_v49 = vrot.slane %v1466_v13, 1  ;;  %v1636_v2 = vadd.f32 %v1635_v39, %v1634_v11 }
 0x1ed   : > { %v1468_v63 = vadd.f32 %v1467_v49, %v1466_v13  ;;  %v1637_v19 = vrot.slane %v1636_v2, 1 }
 0x1ef   : > { %1469 = vst [vmem:[%s214_s19] sm:$0x1] %v1468_v63  ;;  %v1638_v56 = vadd.f32 %v1637_v19, %v1636_v2 }
 0x1f1   : > { %1639 = vst [vmem:[%s217_s22] sm:$0x1] %v1638_v56 }
 0x1f2 PF: > { %s15_s15 = sadd.s32 1, %s2523_s15  }
 0x1f3   : > { %p12_p5 = scmp.ge.s32.totalorder %s15_s15, 6  }
 0x1f5   :  { %14 = sbr.rel (!%p12_p5) target bundleno = 1 (0x1), region = 82 }

// kernel: decoder_forward.3
= control target key start
LH: loop header
LB: loop body
LE: loop exit
PB: predicated region body
PF: predicated region fallthrough
CT: control target
= control target key end

     0   :  { %s1153_s12 = smov 0   ;;  %s1485_s0 = inlined_call_operand.vmem [shape: bf16[2624,128], index: 0, kind: input, shape index: {}]   ;;  %s1486_s1 = inlined_call_operand.vmem [shape: f32[1,128], index: 1, kind: input, shape index: {}]   ;;  %s1487_s2 = inlined_call_operand.vmem [shape: f32[1,128], index: 2, kind: input, shape index: {}]   ;;  %s1488_s3 = inlined_call_operand.vmem [shape: f32[2624,128], index: 3, kind: output, shape index: {}]  }
   0x1 LB: > { %s900_s13 = sadd.s32 4294967295, %s1131_s12   ;;  %p904_p0 = scmp.ge.s32.totalorder %s1131_s12, 1  ;;  %s1131_s12 = sphi %s1153_s12, %s13_s12  }
   0x2   : > { %p138_p1 = scmp.lt.s32.totalorder %s1131_s12, 5 }
   0x4   : > { %p139_p2 = pnand %p904_p0, %p138_p1 }
   0x5   : > { %s162_s14 = smul.u32 (!%p139_p2), 82, %s900_s13 }
   0x6   : > { %142 = sbr.rel (%p139_p2) target bundleno = 144 (0x90), region = 32 }
   0x7   : > { %p163_p3 = scmp.lt.s32.totalorder (!%p139_p2), %s162_s14, 327 }
   0xb   : > { %s1490_s14 = smov (!%p163_p3, %s162_s14), 327  ;;  %v1172_v0 = vld [vmem:[%s1486_s1] ss:$0 sm:$0xff] }
   0xc   : > { %s905_s15 = sshll.u32 %s1490_s14, 2  ;;  %v1181_v9 = vld [vmem:[%s1487_s2] ss:$0 sm:$0xff]  ;;  %s906_s23 = sshll.u32 %s1490_s14, 3 }
   0xd   : > { %s1167_s18 = scalar_lea.vmem %s1485_s0, %s905_s15  ;;  %s1203_s26 = scalar_lea.vmem %s1488_s3, %s906_s23 }
   0xe   : > { %v912_v1 = vld [vmem:[%s1167_s18] sm:$0xff]   ;;  %v1075_v2 = vld [vmem:[%s1167_s18 + $0x8] sm:$0xff]   ;;  %v1076_v3 = vld [vmem:[%s1167_s18 + $0x10] sm:$0xff]  }
   0xf   : > { %v913_v4 = vunpack.c.l.bf16 %v912_v1  ;;  %v914_v5 = vunpack.c.h.bf16 %v912_v1  ;;  %v917_v6 = vunpack.c.l.bf16 %v1075_v2  ;;  %v918_v7 = vunpack.c.h.bf16 %v1075_v2  ;;  %v1077_v8 = vld [vmem:[%s1167_s18 + $0x18] sm:$0xff]   ;;  %v1078_v37 = vld [vmem:[%s1167_s18 + $0x20] sm:$0xff]   ;;  %v1079_v41 = vld [vmem:[%s1167_s18 + $0x28] sm:$0xff]  }
  0x10   : > { %v921_v10 = vunpack.c.l.bf16 %v1076_v3  ;;  %v922_v11 = vunpack.c.h.bf16 %v1076_v3  ;;  %v925_v12 = vunpack.c.l.bf16 %v1077_v8  ;;  %v926_v13 = vunpack.c.h.bf16 %v1077_v8  ;;  %v1080_v42 = vld [vmem:[%s1167_s18 + $0x30] sm:$0xff]   ;;  %v1081_v49 = vld [vmem:[%s1167_s18 + $0x38] sm:$0xff]  }
  0x11   : > { %v345_v14 = vmul.f32 %v913_v4, %v1172_v0  ;;  %v346_v15 = vmul.f32 %v914_v5, %v1172_v0  ;;  %v347_v16 = vmul.f32 %v917_v6, %v1172_v0  ;;  %v348_v17 = vmul.f32 %v918_v7, %v1172_v0  ;;  %v1082_v7 = vld [vmem:[%s1167_s18 + $0x40] sm:$0xff]  }
  0x12   : > { %v349_v18 = vmul.f32 %v921_v10, %v1172_v0  ;;  %v350_v19 = vmul.f32 %v922_v11, %v1172_v0  ;;  %v351_v20 = vmul.f32 %v925_v12, %v1172_v0  ;;  %v352_v21 = vmul.f32 %v926_v13, %v1172_v0 }
  0x13   : > { %v434_v22 = vadd.f32 %v1181_v9, %v345_v14  ;;  %v435_v23 = vadd.f32 %v1181_v9, %v346_v15  ;;  %v436_v24 = vadd.f32 %v1181_v9, %v347_v16  ;;  %v437_v25 = vadd.f32 %v1181_v9, %v348_v17 }
  0x14   : > { %v438_v26 = vadd.f32 %v1181_v9, %v349_v18  ;;  %v439_v27 = vadd.f32 %v1181_v9, %v350_v19  ;;  %v440_v28 = vadd.f32 %v1181_v9, %v351_v20  ;;  %v441_v29 = vadd.f32 %v1181_v9, %v352_v21  ;;  %v1083_v20 = vld [vmem:[%s1167_s18 + $0x48] sm:$0xff]  }
  0x15   : > { %vm516_vm0 = vcmp.ge.f32.partialorder %v434_v22, 0.0  ;;  %v598_v30 = vmul.f32 0.01, %v434_v22  ;;  %vm517_vm1 = vcmp.ge.f32.partialorder %v435_v23, 0.0  ;;  %v599_v31 = vmul.f32 0.01, %v435_v23 }
  0x16   : > { %vm518_vm2 = vcmp.ge.f32.partialorder %v436_v24, 0.0  ;;  %v600_v32 = vmul.f32 0.01, %v436_v24  ;;  %vm519_vm3 = vcmp.ge.f32.partialorder %v437_v25, 0.0  ;;  %v601_v33 = vmul.f32 0.01, %v437_v25 }
  0x17   : > { %v680_v34 = vsel %vm516_vm0, %v434_v22, %v598_v30  ;;  %v681_v35 = vsel %vm517_vm1, %v435_v23, %v599_v31  ;;  %vm520_vm4 = vcmp.ge.f32.partialorder %v438_v26, 0.0  ;;  %v602_v36 = vmul.f32 0.01, %v438_v26 }
  0x18   : > { %762 = vst [vmem:[%s1203_s26] sm:$0xff] %v680_v34  ;;  %763 = vst [vmem:[%s1203_s26 + $0x8] sm:$0xff] %v681_v35  ;;  %v682_v38 = vsel %vm518_vm2, %v436_v24, %v600_v32  ;;  %v683_v39 = vsel %vm519_vm3, %v437_v25, %v601_v33  ;;  %vm521_vm5 = vcmp.ge.f32.partialorder %v439_v27, 0.0  ;;  %v603_v40 = vmul.f32 0.01, %v439_v27  ;;  %v1084_v25 = vld [vmem:[%s1167_s18 + $0x50] sm:$0xff]  }
  0x19   : > { %764 = vst [vmem:[%s1203_s26 + $0x10] sm:$0xff] %v682_v38  ;;  %765 = vst [vmem:[%s1203_s26 + $0x18] sm:$0xff] %v683_v39  ;;  %v684_v43 = vsel %vm520_vm4, %v438_v26, %v602_v36  ;;  %vm522_vm6 = vcmp.ge.f32.partialorder %v440_v28, 0.0  ;;  %v604_v44 = vmul.f32 0.01, %v440_v28  ;;  %vm523_vm7 = vcmp.ge.f32.partialorder %v441_v29, 0.0 }
  0x1a   : > { %766 = vst [vmem:[%s1203_s26 + $0x20] sm:$0xff] %v684_v43  ;;  %v685_v45 = vsel %vm521_vm5, %v439_v27, %v603_v40  ;;  %v605_v46 = vmul.f32 0.01, %v441_v29  ;;  %v929_v47 = vunpack.c.l.bf16 %v1078_v37  ;;  %v930_v48 = vunpack.c.h.bf16 %v1078_v37  ;;  %v1085_v43 = vld [vmem:[%s1167_s18 + $0x58] sm:$0xff]  }
  0x1b   : > { %767 = vst [vmem:[%s1203_s26 + $0x28] sm:$0xff] %v685_v45  ;;  %v686_v50 = vsel %vm522_vm6, %v440_v28, %v604_v44  ;;  %v933_v51 = vunpack.c.l.bf16 %v1079_v41  ;;  %v934_v52 = vunpack.c.h.bf16 %v1079_v41  ;;  %v937_v53 = vunpack.c.l.bf16 %v1080_v42 }
  0x1c   : > { %768 = vst [vmem:[%s1203_s26 + $0x30] sm:$0xff] %v686_v50  ;;  %v687_v54 = vsel %vm523_vm7, %v441_v29, %v605_v46  ;;  %v353_v55 = vmul.f32 %v929_v47, %v1172_v0  ;;  %v354_v56 = vmul.f32 %v930_v48, %v1172_v0  ;;  %v938_v57 = vunpack.c.h.bf16 %v1080_v42 }
  0x1d   : > { %769 = vst [vmem:[%s1203_s26 + $0x38] sm:$0xff] %v687_v54  ;;  %v355_v58 = vmul.f32 %v933_v51, %v1172_v0  ;;  %v356_v59 = vmul.f32 %v934_v52, %v1172_v0  ;;  %v357_v60 = vmul.f32 %v937_v53, %v1172_v0  ;;  %v941_v61 = vunpack.c.l.bf16 %v1081_v49  ;;  %v1086_v54 = vld [vmem:[%s1167_s18 + $0x60] sm:$0xff]  }
  0x1e   : > { %v442_v62 = vadd.f32 %v1181_v9, %v353_v55  ;;  %v443_v63 = vadd.f32 %v1181_v9, %v354_v56  ;;  %v358_v1 = vmul.f32 %v938_v57, %v1172_v0  ;;  %v942_v2 = vunpack.c.h.bf16 %v1081_v49 }
  0x1f   : > { %v444_v3 = vadd.f32 %v1181_v9, %v355_v58  ;;  %v445_v4 = vadd.f32 %v1181_v9, %v356_v59  ;;  %v446_v5 = vadd.f32 %v1181_v9, %v357_v60  ;;  %v359_v6 = vmul.f32 %v941_v61, %v1172_v0 }
  0x20   : > { %vm524_vm8 = vcmp.ge.f32.partialorder %v442_v62, 0.0  ;;  %v606_v8 = vmul.f32 0.01, %v442_v62  ;;  %vm525_vm9 = vcmp.ge.f32.partialorder %v443_v63, 0.0  ;;  %v607_v10 = vmul.f32 0.01, %v443_v63 }
  0x21   : > { %vm526_vm10 = vcmp.ge.f32.partialorder %v444_v3, 0.0  ;;  %v608_v11 = vmul.f32 0.01, %v444_v3  ;;  %vm527_vm11 = vcmp.ge.f32.partialorder %v445_v4, 0.0  ;;  %v609_v12 = vmul.f32 0.01, %v445_v4 }
  0x22   : > { %v688_v13 = vsel %vm524_vm8, %v442_v62, %v606_v8  ;;  %v689_v14 = vsel %vm525_vm9, %v443_v63, %v607_v10  ;;  %vm528_vm12 = vcmp.ge.f32.partialorder %v446_v5, 0.0  ;;  %v610_v15 = vmul.f32 0.01, %v446_v5 }
  0x23   : > { %770 = vst [vmem:[%s1203_s26 + $0x40] sm:$0xff] %v688_v13  ;;  %771 = vst [vmem:[%s1203_s26 + $0x48] sm:$0xff] %v689_v14  ;;  %v690_v16 = vsel %vm526_vm10, %v444_v3, %v608_v11  ;;  %v691_v17 = vsel %vm527_vm11, %v445_v4, %v609_v12  ;;  %v447_v18 = vadd.f32 %v1181_v9, %v358_v1  ;;  %v945_v23 = vunpack.c.l.bf16 %v1082_v7  ;;  %v1087_v1 = vld [vmem:[%s1167_s18 + $0x68] sm:$0xff]  }
  0x24   : > { %v448_v19 = vadd.f32 %v1181_v9, %v359_v6  ;;  %772 = vst [vmem:[%s1203_s26 + $0x50] sm:$0xff] %v690_v16  ;;  %773 = vst [vmem:[%s1203_s26 + $0x58] sm:$0xff] %v691_v17  ;;  %v692_v21 = vsel %vm528_vm12, %v446_v5, %v610_v15  ;;  %v360_v22 = vmul.f32 %v942_v2, %v1172_v0  ;;  %v946_v24 = vunpack.c.h.bf16 %v1082_v7  ;;  %v1088_v2 = vld [vmem:[%s1167_s18 + $0x70] sm:$0xff]  }
  0x25   : > { %774 = vst [vmem:[%s1203_s26 + $0x60] sm:$0xff] %v692_v21  ;;  %vm529_vm13 = vcmp.ge.f32.partialorder %v447_v18, 0.0  ;;  %v611_v26 = vmul.f32 0.01, %v447_v18  ;;  %v361_v29 = vmul.f32 %v945_v23, %v1172_v0  ;;  %v949_v31 = vunpack.c.l.bf16 %v1083_v20  ;;  %v1089_v21 = vld [vmem:[%s1167_s18 + $0x78] sm:$0xff]  }
  0x26   : > { %vm530_vm14 = vcmp.ge.f32.partialorder %v448_v19, 0.0  ;;  %v612_v27 = vmul.f32 0.01, %v448_v19  ;;  %v449_v28 = vadd.f32 %v1181_v9, %v360_v22  ;;  %v362_v30 = vmul.f32 %v946_v24, %v1172_v0 }
  0x27   : > { %v693_v32 = vsel %vm529_vm13, %v447_v18, %v611_v26  ;;  %v950_v34 = vunpack.c.h.bf16 %v1083_v20  ;;  %v953_v35 = vunpack.c.l.bf16 %v1084_v25  ;;  %v450_v37 = vadd.f32 %v1181_v9, %v361_v29 }
  0x28   : > { %v694_v33 = vsel %vm530_vm14, %v448_v19, %v612_v27  ;;  %775 = vst [vmem:[%s1203_s26 + $0x68] sm:$0xff] %v693_v32  ;;  %vm531_vm15 = vcmp.ge.f32.partialorder %v449_v28, 0.0  ;;  %v613_v36 = vmul.f32 0.01, %v449_v28  ;;  %v451_v38 = vadd.f32 %v1181_v9, %v362_v30 }
  0x29   : > { %776 = vst [vmem:[%s1203_s26 + $0x70] sm:$0xff] %v694_v33  ;;  %v363_v39 = vmul.f32 %v949_v31, %v1172_v0  ;;  %v364_v40 = vmul.f32 %v950_v34, %v1172_v0  ;;  %v365_v41 = vmul.f32 %v953_v35, %v1172_v0  ;;  %v954_v42 = vunpack.c.h.bf16 %v1084_v25  ;;  %v1090_v35 = vld [vmem:[%s1167_s18 + $0x80] sm:$0xff]  }
  0x2a   : > { %v695_v44 = vsel %vm531_vm15, %v449_v28, %v613_v36  ;;  %vm532_vm0 = vcmp.ge.f32.partialorder %v450_v37, 0.0  ;;  %v614_v45 = vmul.f32 0.01, %v450_v37  ;;  %vm533_vm1 = vcmp.ge.f32.partialorder %v451_v38, 0.0 }
  0x2b   : > { %777 = vst [vmem:[%s1203_s26 + $0x78] sm:$0xff] %v695_v44  ;;  %v615_v46 = vmul.f32 0.01, %v451_v38  ;;  %v452_v47 = vadd.f32 %v1181_v9, %v363_v39  ;;  %v453_v48 = vadd.f32 %v1181_v9, %v364_v40  ;;  %v454_v49 = vadd.f32 %v1181_v9, %v365_v41 }
  0x2c   : > { %v696_v50 = vsel %vm532_vm0, %v450_v37, %v614_v45  ;;  %v366_v51 = vmul.f32 %v954_v42, %v1172_v0  ;;  %v957_v52 = vunpack.c.l.bf16 %v1085_v43  ;;  %v958_v53 = vunpack.c.h.bf16 %v1085_v43  ;;  %v1091_v42 = vld [vmem:[%s1167_s18 + $0x88] sm:$0xff]  }
  0x2d   : > { %778 = vst [vmem:[%s1203_s26 + $0x80] sm:$0xff] %v696_v50  ;;  %v697_v55 = vsel %vm533_vm1, %v451_v38, %v615_v46  ;;  %vm534_vm2 = vcmp.ge.f32.partialorder %v452_v47, 0.0  ;;  %v616_v56 = vmul.f32 0.01, %v452_v47  ;;  %vm535_vm3 = vcmp.ge.f32.partialorder %v453_v48, 0.0 }
  0x2e   : > { %779 = vst [vmem:[%s1203_s26 + $0x88] sm:$0xff] %v697_v55  ;;  %v617_v57 = vmul.f32 0.01, %v453_v48  ;;  %vm536_vm4 = vcmp.ge.f32.partialorder %v454_v49, 0.0  ;;  %v618_v58 = vmul.f32 0.01, %v454_v49  ;;  %v455_v59 = vadd.f32 %v1181_v9, %v366_v51 }
  0x2f   : > { %v698_v60 = vsel %vm534_vm2, %v452_v47, %v616_v56  ;;  %v367_v61 = vmul.f32 %v957_v52, %v1172_v0  ;;  %v368_v62 = vmul.f32 %v958_v53, %v1172_v0  ;;  %v961_v63 = vunpack.c.l.bf16 %v1086_v54 }
  0x30   : > { %780 = vst [vmem:[%s1203_s26 + $0x90] sm:$0xff] %v698_v60  ;;  %v699_v3 = vsel %vm535_vm3, %v453_v48, %v617_v57  ;;  %v700_v4 = vsel %vm536_vm4, %v454_v49, %v618_v58  ;;  %vm537_vm5 = vcmp.ge.f32.partialorder %v455_v59, 0.0  ;;  %v619_v5 = vmul.f32 0.01, %v455_v59 }
  0x31   : > { %781 = vst [vmem:[%s1203_s26 + $0x98] sm:$0xff] %v699_v3  ;;  %782 = vst [vmem:[%s1203_s26 + $0xa0] sm:$0xff] %v700_v4  ;;  %v456_v6 = vadd.f32 %v1181_v9, %v367_v61  ;;  %v457_v7 = vadd.f32 %v1181_v9, %v368_v62  ;;  %v369_v8 = vmul.f32 %v961_v63, %v1172_v0  ;;  %v962_v10 = vunpack.c.h.bf16 %v1086_v54  ;;  %v1092_v54 = vld [vmem:[%s1167_s18 + $0x90] sm:$0xff]   ;;  %v1093_v3 = vld [vmem:[%s1167_s18 + $0x98] sm:$0xff]  }
  0x32   : > { %v701_v11 = vsel %vm537_vm5, %v455_v59, %v619_v5  ;;  %v965_v12 = vunpack.c.l.bf16 %v1087_v1  ;;  %v966_v13 = vunpack.c.h.bf16 %v1087_v1  ;;  %v969_v14 = vunpack.c.l.bf16 %v1088_v2 }
  0x33   : > { %783 = vst [vmem:[%s1203_s26 + $0xa8] sm:$0xff] %v701_v11  ;;  %vm538_vm6 = vcmp.ge.f32.partialorder %v456_v6, 0.0  ;;  %v620_v15 = vmul.f32 0.01, %v456_v6  ;;  %vm539_vm7 = vcmp.ge.f32.partialorder %v457_v7, 0.0  ;;  %v458_v17 = vadd.f32 %v1181_v9, %v369_v8 }
  0x34   : > { %v621_v16 = vmul.f32 0.01, %v457_v7  ;;  %v370_v18 = vmul.f32 %v962_v10, %v1172_v0  ;;  %v371_v19 = vmul.f32 %v965_v12, %v1172_v0  ;;  %v372_v20 = vmul.f32 %v966_v13, %v1172_v0 }
  0x35   : > { %v702_v22 = vsel %vm538_vm6, %v456_v6, %v620_v15  ;;  %v373_v24 = vmul.f32 %v969_v14, %v1172_v0  ;;  %v970_v25 = vunpack.c.h.bf16 %v1088_v2  ;;  %vm540_vm8 = vcmp.ge.f32.partialorder %v458_v17, 0.0 }
  0x36   : > { %v703_v23 = vsel %vm539_vm7, %v457_v7, %v621_v16  ;;  %784 = vst [vmem:[%s1203_s26 + $0xb0] sm:$0xff] %v702_v22  ;;  %v622_v26 = vmul.f32 0.01, %v458_v17  ;;  %v459_v27 = vadd.f32 %v1181_v9, %v370_v18  ;;  %v460_v28 = vadd.f32 %v1181_v9, %v371_v19 }
  0x37   : > { %785 = vst [vmem:[%s1203_s26 + $0xb8] sm:$0xff] %v703_v23  ;;  %v461_v29 = vadd.f32 %v1181_v9, %v372_v20  ;;  %v462_v30 = vadd.f32 %v1181_v9, %v373_v24  ;;  %v374_v31 = vmul.f32 %v970_v25, %v1172_v0  ;;  %v973_v32 = vunpack.c.l.bf16 %v1089_v21  ;;  %v1094_v20 = vld [vmem:[%s1167_s18 + $0xa0] sm:$0xff]   ;;  %v1095_v25 = vld [vmem:[%s1167_s18 + $0xa8] sm:$0xff]  }
  0x38   : > { %v704_v33 = vsel %vm540_vm8, %v458_v17, %v622_v26  ;;  %vm541_vm9 = vcmp.ge.f32.partialorder %v459_v27, 0.0  ;;  %v623_v34 = vmul.f32 0.01, %v459_v27  ;;  %vm542_vm10 = vcmp.ge.f32.partialorder %v460_v28, 0.0 }
  0x39   : > { %786 = vst [vmem:[%s1203_s26 + $0xc0] sm:$0xff] %v704_v33  ;;  %v624_v36 = vmul.f32 0.01, %v460_v28  ;;  %vm543_vm11 = vcmp.ge.f32.partialorder %v461_v29, 0.0  ;;  %v625_v37 = vmul.f32 0.01, %v461_v29  ;;  %v463_v40 = vadd.f32 %v1181_v9, %v374_v31 }
  0x3a   : > { %vm544_vm12 = vcmp.ge.f32.partialorder %v462_v30, 0.0  ;;  %v705_v38 = vsel %vm541_vm9, %v459_v27, %v623_v34  ;;  %v626_v39 = vmul.f32 0.01, %v462_v30  ;;  %v375_v41 = vmul.f32 %v973_v32, %v1172_v0 }
  0x3b   : > { %787 = vst [vmem:[%s1203_s26 + $0xc8] sm:$0xff] %v705_v38  ;;  %v706_v43 = vsel %vm542_vm10, %v460_v28, %v624_v36  ;;  %v707_v44 = vsel %vm543_vm11, %v461_v29, %v625_v37  ;;  %v974_v45 = vunpack.c.h.bf16 %v1089_v21  ;;  %v977_v46 = vunpack.c.l.bf16 %v1090_v35  ;;  %v1096_v36 = vld [vmem:[%s1167_s18 + $0xb0] sm:$0xff]  }
  0x3c   : > { %788 = vst [vmem:[%s1203_s26 + $0xd0] sm:$0xff] %v706_v43  ;;  %789 = vst [vmem:[%s1203_s26 + $0xd8] sm:$0xff] %v707_v44  ;;  %v708_v47 = vsel %vm544_vm12, %v462_v30, %v626_v39  ;;  %vm545_vm13 = vcmp.ge.f32.partialorder %v463_v40, 0.0  ;;  %v627_v48 = vmul.f32 0.01, %v463_v40  ;;  %v464_v49 = vadd.f32 %v1181_v9, %v375_v41  ;;  %v1097_v44 = vld [vmem:[%s1167_s18 + $0xb8] sm:$0xff]  }
  0x3d   : > { %790 = vst [vmem:[%s1203_s26 + $0xe0] sm:$0xff] %v708_v47  ;;  %v376_v50 = vmul.f32 %v974_v45, %v1172_v0  ;;  %v377_v51 = vmul.f32 %v977_v46, %v1172_v0  ;;  %v978_v52 = vunpack.c.h.bf16 %v1090_v35  ;;  %v981_v53 = vunpack.c.l.bf16 %v1091_v42 }
  0x3e   : > { %v709_v55 = vsel %vm545_vm13, %v463_v40, %v627_v48  ;;  %vm546_vm14 = vcmp.ge.f32.partialorder %v464_v49, 0.0  ;;  %v628_v56 = vmul.f32 0.01, %v464_v49  ;;  %v982_v57 = vunpack.c.h.bf16 %v1091_v42 }
  0x3f   : > { %791 = vst [vmem:[%s1203_s26 + $0xe8] sm:$0xff] %v709_v55  ;;  %v465_v58 = vadd.f32 %v1181_v9, %v376_v50  ;;  %v466_v59 = vadd.f32 %v1181_v9, %v377_v51  ;;  %v378_v60 = vmul.f32 %v978_v52, %v1172_v0  ;;  %v379_v61 = vmul.f32 %v981_v53, %v1172_v0 }
  0x40   : > { %v710_v62 = vsel %vm546_vm14, %v464_v49, %v628_v56  ;;  %v380_v63 = vmul.f32 %v982_v57, %v1172_v0  ;;  %v985_v1 = vunpack.c.l.bf16 %v1092_v54  ;;  %v986_v2 = vunpack.c.h.bf16 %v1092_v54  ;;  %v1098_v56 = vld [vmem:[%s1167_s18 + $0xc0] sm:$0xff]  }
  0x41   : > { %792 = vst [vmem:[%s1203_s26 + $0xf0] sm:$0xff] %v710_v62  ;;  %vm547_vm15 = vcmp.ge.f32.partialorder %v465_v58, 0.0  ;;  %v629_v4 = vmul.f32 0.01, %v465_v58  ;;  %vm548_vm0 = vcmp.ge.f32.partialorder %v466_v59, 0.0  ;;  %v467_v6 = vadd.f32 %v1181_v9, %v378_v60 }
  0x42   : > { %v630_v5 = vmul.f32 0.01, %v466_v59  ;;  %v468_v7 = vadd.f32 %v1181_v9, %v379_v61  ;;  %v469_v8 = vadd.f32 %v1181_v9, %v380_v63  ;;  %v381_v10 = vmul.f32 %v985_v1, %v1172_v0 }
  0x43   : > { %v711_v11 = vsel %vm547_vm15, %v465_v58, %v629_v4  ;;  %v382_v13 = vmul.f32 %v986_v2, %v1172_v0  ;;  %v989_v14 = vunpack.c.l.bf16 %v1093_v3  ;;  %vm549_vm1 = vcmp.ge.f32.partialorder %v467_v6, 0.0  ;;  %v1099_v2 = vld [vmem:[%s1167_s18 + $0xc8] sm:$0xff]  }
  0x44   : > { %v712_v12 = vsel %vm548_vm0, %v466_v59, %v630_v5  ;;  %793 = vst [vmem:[%s1203_s26 + $0xf8] sm:$0xff] %v711_v11  ;;  %v631_v15 = vmul.f32 0.01, %v467_v6  ;;  %vm550_vm2 = vcmp.ge.f32.partialorder %v468_v7, 0.0  ;;  %v632_v16 = vmul.f32 0.01, %v468_v7 }
  0x45   : > { %794 = vst [vmem:[%s1203_s26 + $0x100] sm:$0xff] %v712_v12  ;;  %vm551_vm3 = vcmp.ge.f32.partialorder %v469_v8, 0.0  ;;  %v633_v17 = vmul.f32 0.01, %v469_v8  ;;  %v470_v18 = vadd.f32 %v1181_v9, %v381_v10  ;;  %v471_v19 = vadd.f32 %v1181_v9, %v382_v13 }
  0x46   : > { %v713_v21 = vsel %vm549_vm1, %v467_v6, %v631_v15  ;;  %v714_v22 = vsel %vm550_vm2, %v468_v7, %v632_v16  ;;  %v383_v23 = vmul.f32 %v989_v14, %v1172_v0  ;;  %v990_v24 = vunpack.c.h.bf16 %v1093_v3 }
  0x47   : > { %795 = vst [vmem:[%s1203_s26 + $0x108] sm:$0xff] %v713_v21  ;;  %796 = vst [vmem:[%s1203_s26 + $0x110] sm:$0xff] %v714_v22  ;;  %v715_v26 = vsel %vm551_vm3, %v469_v8, %v633_v17  ;;  %vm552_vm4 = vcmp.ge.f32.partialorder %v470_v18, 0.0  ;;  %v634_v27 = vmul.f32 0.01, %v470_v18  ;;  %vm553_vm5 = vcmp.ge.f32.partialorder %v471_v19, 0.0 }
  0x48   : > { %797 = vst [vmem:[%s1203_s26 + $0x118] sm:$0xff] %v715_v26  ;;  %v635_v28 = vmul.f32 0.01, %v471_v19  ;;  %v472_v29 = vadd.f32 %v1181_v9, %v383_v23  ;;  %v384_v30 = vmul.f32 %v990_v24, %v1172_v0  ;;  %v993_v31 = vunpack.c.l.bf16 %v1094_v20 }
  0x49   : > { %v716_v32 = vsel %vm552_vm4, %v470_v18, %v634_v27  ;;  %v994_v33 = vunpack.c.h.bf16 %v1094_v20  ;;  %v997_v34 = vunpack.c.l.bf16 %v1095_v25  ;;  %v998_v35 = vunpack.c.h.bf16 %v1095_v25  ;;  %v1100_v25 = vld [vmem:[%s1167_s18 + $0xd0] sm:$0xff]  }
  0x4a   : > { %798 = vst [vmem:[%s1203_s26 + $0x120] sm:$0xff] %v716_v32  ;;  %v717_v37 = vsel %vm553_vm5, %v471_v19, %v635_v28  ;;  %vm554_vm6 = vcmp.ge.f32.partialorder %v472_v29, 0.0  ;;  %v636_v38 = vmul.f32 0.01, %v472_v29  ;;  %v473_v39 = vadd.f32 %v1181_v9, %v384_v30  ;;  %v1101_v32 = vld [vmem:[%s1167_s18 + $0xd8] sm:$0xff]  }
  0x4b   : > { %799 = vst [vmem:[%s1203_s26 + $0x128] sm:$0xff] %v717_v37  ;;  %v385_v40 = vmul.f32 %v993_v31, %v1172_v0  ;;  %v386_v41 = vmul.f32 %v994_v33, %v1172_v0  ;;  %v387_v42 = vmul.f32 %v997_v34, %v1172_v0  ;;  %v388_v43 = vmul.f32 %v998_v35, %v1172_v0 }
  0x4c   : > { %v718_v45 = vsel %vm554_vm6, %v472_v29, %v636_v38  ;;  %vm555_vm7 = vcmp.ge.f32.partialorder %v473_v39, 0.0  ;;  %v637_v46 = vmul.f32 0.01, %v473_v39  ;;  %v1001_v47 = vunpack.c.l.bf16 %v1096_v36 }
  0x4d   : > { %800 = vst [vmem:[%s1203_s26 + $0x130] sm:$0xff] %v718_v45  ;;  %v474_v48 = vadd.f32 %v1181_v9, %v385_v40  ;;  %v475_v49 = vadd.f32 %v1181_v9, %v386_v41  ;;  %v476_v50 = vadd.f32 %v1181_v9, %v387_v42  ;;  %v477_v51 = vadd.f32 %v1181_v9, %v388_v43 }
  0x4e   : > { %v719_v52 = vsel %vm555_vm7, %v473_v39, %v637_v46  ;;  %v389_v53 = vmul.f32 %v1001_v47, %v1172_v0  ;;  %v1002_v54 = vunpack.c.h.bf16 %v1096_v36  ;;  %v1005_v55 = vunpack.c.l.bf16 %v1097_v44  ;;  %v1102_v39 = vld [vmem:[%s1167_s18 + $0xe0] sm:$0xff]  }
  0x4f   : > { %801 = vst [vmem:[%s1203_s26 + $0x138] sm:$0xff] %v719_v52  ;;  %vm556_vm8 = vcmp.ge.f32.partialorder %v474_v48, 0.0  ;;  %v638_v57 = vmul.f32 0.01, %v474_v48  ;;  %vm557_vm9 = vcmp.ge.f32.partialorder %v475_v49, 0.0  ;;  %vm558_vm10 = vcmp.ge.f32.partialorder %v476_v50, 0.0 }
  0x50   : > { %v639_v58 = vmul.f32 0.01, %v475_v49  ;;  %v640_v59 = vmul.f32 0.01, %v476_v50  ;;  %vm559_vm11 = vcmp.ge.f32.partialorder %v477_v51, 0.0  ;;  %v478_v63 = vadd.f32 %v1181_v9, %v389_v53 }
  0x51   : > { %v641_v60 = vmul.f32 0.01, %v477_v51  ;;  %v720_v61 = vsel %vm556_vm8, %v474_v48, %v638_v57  ;;  %v390_v1 = vmul.f32 %v1002_v54, %v1172_v0  ;;  %v391_v5 = vmul.f32 %v1005_v55, %v1172_v0 }
  0x52   : > { %v721_v62 = vsel %vm557_vm9, %v475_v49, %v639_v58  ;;  %802 = vst [vmem:[%s1203_s26 + $0x140] sm:$0xff] %v720_v61  ;;  %v722_v3 = vsel %vm558_vm10, %v476_v50, %v640_v59  ;;  %v1006_v6 = vunpack.c.h.bf16 %v1097_v44  ;;  %vm560_vm12 = vcmp.ge.f32.partialorder %v478_v63, 0.0  ;;  %v1103_v44 = vld [vmem:[%s1167_s18 + $0xe8] sm:$0xff]  }
  0x53   : > { %803 = vst [vmem:[%s1203_s26 + $0x148] sm:$0xff] %v721_v62  ;;  %v723_v4 = vsel %vm559_vm11, %v477_v51, %v641_v60  ;;  %804 = vst [vmem:[%s1203_s26 + $0x150] sm:$0xff] %v722_v3  ;;  %v642_v7 = vmul.f32 0.01, %v478_v63  ;;  %v479_v8 = vadd.f32 %v1181_v9, %v390_v1  ;;  %v1009_v10 = vunpack.c.l.bf16 %v1098_v56 }
  0x54   : > { %805 = vst [vmem:[%s1203_s26 + $0x158] sm:$0xff] %v723_v4  ;;  %v480_v11 = vadd.f32 %v1181_v9, %v391_v5  ;;  %v392_v12 = vmul.f32 %v1006_v6, %v1172_v0  ;;  %v1010_v13 = vunpack.c.h.bf16 %v1098_v56  ;;  %v1013_v14 = vunpack.c.l.bf16 %v1099_v2 }
  0x55   : > { %v724_v15 = vsel %vm560_vm12, %v478_v63, %v642_v7  ;;  %vm561_vm13 = vcmp.ge.f32.partialorder %v479_v8, 0.0  ;;  %v643_v16 = vmul.f32 0.01, %v479_v8  ;;  %v393_v17 = vmul.f32 %v1009_v10, %v1172_v0  ;;  %v1104_v10 = vld [vmem:[%s1167_s18 + $0xf0] sm:$0xff]  }
  0x56   : > { %806 = vst [vmem:[%s1203_s26 + $0x160] sm:$0xff] %v724_v15  ;;  %vm562_vm14 = vcmp.ge.f32.partialorder %v480_v11, 0.0  ;;  %v644_v18 = vmul.f32 0.01, %v480_v11  ;;  %v481_v19 = vadd.f32 %v1181_v9, %v392_v12  ;;  %v394_v20 = vmul.f32 %v1010_v13, %v1172_v0  ;;  %v1106_v15 = vld [vmem:[%s1167_s18 + $0x100] sm:$0xff]  }
  0x57   : > { %v725_v21 = vsel %vm561_vm13, %v479_v8, %v643_v16  ;;  %v482_v22 = vadd.f32 %v1181_v9, %v393_v17  ;;  %v395_v23 = vmul.f32 %v1013_v14, %v1172_v0  ;;  %v1014_v24 = vunpack.c.h.bf16 %v1099_v2  ;;  %v1105_v14 = vld [vmem:[%s1167_s18 + $0xf8] sm:$0xff]  }
  0x58   : > { %807 = vst [vmem:[%s1203_s26 + $0x168] sm:$0xff] %v725_v21  ;;  %v726_v26 = vsel %vm562_vm14, %v480_v11, %v644_v18  ;;  %vm563_vm15 = vcmp.ge.f32.partialorder %v481_v19, 0.0  ;;  %v645_v27 = vmul.f32 0.01, %v481_v19  ;;  %v483_v28 = vadd.f32 %v1181_v9, %v394_v20 }
  0x59   : > { %808 = vst [vmem:[%s1203_s26 + $0x170] sm:$0xff] %v726_v26  ;;  %vm564_vm0 = vcmp.ge.f32.partialorder %v482_v22, 0.0  ;;  %v646_v29 = vmul.f32 0.01, %v482_v22  ;;  %v484_v30 = vadd.f32 %v1181_v9, %v395_v23  ;;  %v396_v31 = vmul.f32 %v1014_v24, %v1172_v0 }
  0x5a   : > { %v727_v33 = vsel %vm563_vm15, %v481_v19, %v645_v27  ;;  %vm565_vm1 = vcmp.ge.f32.partialorder %v483_v28, 0.0  ;;  %v647_v34 = vmul.f32 0.01, %v483_v28  ;;  %v1017_v35 = vunpack.c.l.bf16 %v1100_v25 }
  0x5b   : > { %809 = vst [vmem:[%s1203_s26 + $0x178] sm:$0xff] %v727_v33  ;;  %v728_v36 = vsel %vm564_vm0, %v482_v22, %v646_v29  ;;  %vm566_vm2 = vcmp.ge.f32.partialorder %v484_v30, 0.0  ;;  %v648_v37 = vmul.f32 0.01, %v484_v30  ;;  %v485_v38 = vadd.f32 %v1181_v9, %v396_v31  ;;  %v1107_v22 = vld [vmem:[%s1167_s18 + $0x108] sm:$0xff]  }
  0x5c   : > { %810 = vst [vmem:[%s1203_s26 + $0x180] sm:$0xff] %v728_v36  ;;  %v729_v40 = vsel %vm565_vm1, %v483_v28, %v647_v34  ;;  %v397_v41 = vmul.f32 %v1017_v35, %v1172_v0  ;;  %v1018_v42 = vunpack.c.h.bf16 %v1100_v25  ;;  %v1021_v43 = vunpack.c.l.bf16 %v1101_v32 }
  0x5d   : > { %811 = vst [vmem:[%s1203_s26 + $0x188] sm:$0xff] %v729_v40  ;;  %v730_v45 = vsel %vm566_vm2, %v484_v30, %v648_v37  ;;  %vm567_vm3 = vcmp.ge.f32.partialorder %v485_v38, 0.0  ;;  %v649_v46 = vmul.f32 0.01, %v485_v38  ;;  %v1022_v47 = vunpack.c.h.bf16 %v1101_v32 }
  0x5e   : > { %812 = vst [vmem:[%s1203_s26 + $0x190] sm:$0xff] %v730_v45  ;;  %v486_v48 = vadd.f32 %v1181_v9, %v397_v41  ;;  %v398_v49 = vmul.f32 %v1018_v42, %v1172_v0  ;;  %v399_v50 = vmul.f32 %v1021_v43, %v1172_v0  ;;  %v1025_v51 = vunpack.c.l.bf16 %v1102_v39 }
  0x5f   : > { %v731_v52 = vsel %vm567_vm3, %v485_v38, %v649_v46  ;;  %v400_v53 = vmul.f32 %v1022_v47, %v1172_v0  ;;  %v1026_v54 = vunpack.c.h.bf16 %v1102_v39  ;;  %v1029_v55 = vunpack.c.l.bf16 %v1103_v44 }
  0x60   : > { %813 = vst [vmem:[%s1203_s26 + $0x198] sm:$0xff] %v731_v52  ;;  %vm568_vm4 = vcmp.ge.f32.partialorder %v486_v48, 0.0  ;;  %v650_v56 = vmul.f32 0.01, %v486_v48  ;;  %v487_v57 = vadd.f32 %v1181_v9, %v398_v49  ;;  %v488_v58 = vadd.f32 %v1181_v9, %v399_v50  ;;  %v1108_v50 = vld [vmem:[%s1167_s18 + $0x110] sm:$0xff]  }
  0x61   : > { %v489_v59 = vadd.f32 %v1181_v9, %v400_v53  ;;  %v401_v60 = vmul.f32 %v1025_v51, %v1172_v0  ;;  %v402_v61 = vmul.f32 %v1026_v54, %v1172_v0  ;;  %v403_v62 = vmul.f32 %v1029_v55, %v1172_v0  ;;  %v1109_v55 = vld [vmem:[%s1167_s18 + $0x118] sm:$0xff]  }
  0x62   : > { %v732_v63 = vsel %vm568_vm4, %v486_v48, %v650_v56  ;;  %vm569_vm5 = vcmp.ge.f32.partialorder %v487_v57, 0.0  ;;  %v651_v1 = vmul.f32 0.01, %v487_v57  ;;  %vm570_vm6 = vcmp.ge.f32.partialorder %v488_v58, 0.0 }
  0x63   : > { %814 = vst [vmem:[%s1203_s26 + $0x1a0] sm:$0xff] %v732_v63  ;;  %v652_v2 = vmul.f32 0.01, %v488_v58  ;;  %vm571_vm7 = vcmp.ge.f32.partialorder %v489_v59, 0.0  ;;  %v653_v3 = vmul.f32 0.01, %v489_v59  ;;  %v490_v4 = vadd.f32 %v1181_v9, %v401_v60 }
  0x64   : > { %v733_v5 = vsel %vm569_vm5, %v487_v57, %v651_v1  ;;  %v491_v6 = vadd.f32 %v1181_v9, %v402_v61  ;;  %v492_v7 = vadd.f32 %v1181_v9, %v403_v62  ;;  %v1030_v8 = vunpack.c.h.bf16 %v1103_v44 }
  0x65   : > { %815 = vst [vmem:[%s1203_s26 + $0x1a8] sm:$0xff] %v733_v5  ;;  %v734_v11 = vsel %vm570_vm6, %v488_v58, %v652_v2  ;;  %v735_v12 = vsel %vm571_vm7, %v489_v59, %v653_v3  ;;  %vm572_vm8 = vcmp.ge.f32.partialorder %v490_v4, 0.0  ;;  %v654_v13 = vmul.f32 0.01, %v490_v4  ;;  %v1110_v3 = vld [vmem:[%s1167_s18 + $0x120] sm:$0xff]  }
  0x66   : > { %816 = vst [vmem:[%s1203_s26 + $0x1b0] sm:$0xff] %v734_v11  ;;  %817 = vst [vmem:[%s1203_s26 + $0x1b8] sm:$0xff] %v735_v12  ;;  %vm573_vm9 = vcmp.ge.f32.partialorder %v491_v6, 0.0  ;;  %v655_v16 = vmul.f32 0.01, %v491_v6  ;;  %vm574_vm10 = vcmp.ge.f32.partialorder %v492_v7, 0.0  ;;  %v404_v19 = vmul.f32 %v1030_v8, %v1172_v0 }
  0x67   : > { %v656_v17 = vmul.f32 0.01, %v492_v7  ;;  %v736_v18 = vsel %vm572_vm8, %v490_v4, %v654_v13  ;;  %v1033_v20 = vunpack.c.l.bf16 %v1104_v10  ;;  %v1034_v21 = vunpack.c.h.bf16 %v1104_v10  ;;  %v1111_v12 = vld [vmem:[%s1167_s18 + $0x128] sm:$0xff]  }
  0x68   : > { %818 = vst [vmem:[%s1203_s26 + $0x1c0] sm:$0xff] %v736_v18  ;;  %v737_v23 = vsel %vm573_vm9, %v491_v6, %v655_v16  ;;  %v1037_v25 = vunpack.c.l.bf16 %v1105_v14  ;;  %v1038_v26 = vunpack.c.h.bf16 %v1105_v14  ;;  %v493_v27 = vadd.f32 %v1181_v9, %v404_v19 }
  0x69   : > { %v738_v24 = vsel %vm574_vm10, %v492_v7, %v656_v17  ;;  %819 = vst [vmem:[%s1203_s26 + $0x1c8] sm:$0xff] %v737_v23  ;;  %v405_v28 = vmul.f32 %v1033_v20, %v1172_v0  ;;  %v406_v29 = vmul.f32 %v1034_v21, %v1172_v0  ;;  %v1041_v30 = vunpack.c.l.bf16 %v1106_v15  ;;  %v1427_v7 = vld [vmem:[%s1486_s1] ss:$0 sm:$0xff] }
  0x6a   : > { %820 = vst [vmem:[%s1203_s26 + $0x1d0] sm:$0xff] %v738_v24  ;;  %v407_v31 = vmul.f32 %v1037_v25, %v1172_v0  ;;  %v408_v32 = vmul.f32 %v1038_v26, %v1172_v0  ;;  %v1042_v33 = vunpack.c.h.bf16 %v1106_v15  ;;  %v1045_v34 = vunpack.c.l.bf16 %v1107_v22  ;;  %v1438_v15 = vld [vmem:[%s1487_s2] ss:$0 sm:$0xff]  ;;  %v1112_v24 = vld [vmem:[%s1167_s18 + $0x130] sm:$0xff]  }
  0x6b   : > { %vm575_vm11 = vcmp.ge.f32.partialorder %v493_v27, 0.0  ;;  %v657_v35 = vmul.f32 0.01, %v493_v27  ;;  %v494_v36 = vadd.f32 %v1181_v9, %v405_v28  ;;  %v495_v37 = vadd.f32 %v1181_v9, %v406_v29 }
  0x6c   : > { %v496_v38 = vadd.f32 %v1181_v9, %v407_v31  ;;  %v497_v39 = vadd.f32 %v1181_v9, %v408_v32  ;;  %v409_v40 = vmul.f32 %v1041_v30, %v1172_v0  ;;  %v410_v41 = vmul.f32 %v1042_v33, %v1172_v0  ;;  %v1113_v33 = vld [vmem:[%s1167_s18 + $0x138] sm:$0xff]  }
  0x6d   : > { %v739_v42 = vsel %vm575_vm11, %v493_v27, %v657_v35  ;;  %vm576_vm12 = vcmp.ge.f32.partialorder %v494_v36, 0.0  ;;  %v658_v43 = vmul.f32 0.01, %v494_v36  ;;  %vm577_vm13 = vcmp.ge.f32.partialorder %v495_v37, 0.0 }
  0x6e   : > { %821 = vst [vmem:[%s1203_s26 + $0x1d8] sm:$0xff] %v739_v42  ;;  %v659_v44 = vmul.f32 0.01, %v495_v37  ;;  %vm578_vm14 = vcmp.ge.f32.partialorder %v496_v38, 0.0  ;;  %v660_v45 = vmul.f32 0.01, %v496_v38  ;;  %v498_v48 = vadd.f32 %v1181_v9, %v409_v40 }
  0x6f   : > { %vm579_vm15 = vcmp.ge.f32.partialorder %v497_v39, 0.0  ;;  %v740_v46 = vsel %vm576_vm12, %v494_v36, %v658_v43  ;;  %v661_v47 = vmul.f32 0.01, %v497_v39  ;;  %v499_v49 = vadd.f32 %v1181_v9, %v410_v41 }
  0x70   : > { %822 = vst [vmem:[%s1203_s26 + $0x1e0] sm:$0xff] %v740_v46  ;;  %v741_v51 = vsel %vm577_vm13, %v495_v37, %v659_v44  ;;  %v742_v52 = vsel %vm578_vm14, %v496_v38, %v660_v45  ;;  %v411_v53 = vmul.f32 %v1045_v34, %v1172_v0  ;;  %v1046_v54 = vunpack.c.h.bf16 %v1107_v22 }
  0x71   : > { %823 = vst [vmem:[%s1203_s26 + $0x1e8] sm:$0xff] %v741_v51  ;;  %824 = vst [vmem:[%s1203_s26 + $0x1f0] sm:$0xff] %v742_v52  ;;  %v743_v56 = vsel %vm579_vm15, %v497_v39, %v661_v47  ;;  %vm580_vm0 = vcmp.ge.f32.partialorder %v498_v48, 0.0  ;;  %v662_v57 = vmul.f32 0.01, %v498_v48  ;;  %vm581_vm1 = vcmp.ge.f32.partialorder %v499_v49, 0.0 }
  0x72   : > { %825 = vst [vmem:[%s1203_s26 + $0x1f8] sm:$0xff] %v743_v56  ;;  %v663_v58 = vmul.f32 0.01, %v499_v49  ;;  %v500_v59 = vadd.f32 %v1181_v9, %v411_v53  ;;  %v412_v60 = vmul.f32 %v1046_v54, %v1172_v0  ;;  %v1049_v61 = vunpack.c.l.bf16 %v1108_v50 }
  0x73   : > { %v744_v62 = vsel %vm580_vm0, %v498_v48, %v662_v57  ;;  %v1050_v63 = vunpack.c.h.bf16 %v1108_v50  ;;  %v1053_v1 = vunpack.c.l.bf16 %v1109_v55  ;;  %v1054_v2 = vunpack.c.h.bf16 %v1109_v55  ;;  %v1114_v55 = vld [vmem:[%s1167_s18 + $0x140] sm:$0xff]  }
  0x74   : > { %826 = vst [vmem:[%s1203_s26 + $0x200] sm:$0xff] %v744_v62  ;;  %v745_v4 = vsel %vm581_vm1, %v499_v49, %v663_v58  ;;  %vm582_vm2 = vcmp.ge.f32.partialorder %v500_v59, 0.0  ;;  %v664_v5 = vmul.f32 0.01, %v500_v59  ;;  %v501_v6 = vadd.f32 %v1181_v9, %v412_v60 }
  0x75   : > { %827 = vst [vmem:[%s1203_s26 + $0x208] sm:$0xff] %v745_v4  ;;  %v413_v0 = vmul.f32 %v1427_v7, %v1049_v61  ;;  %v414_v8 = vmul.f32 %v1427_v7, %v1050_v63  ;;  %v415_v10 = vmul.f32 %v1427_v7, %v1053_v1  ;;  %v416_v11 = vmul.f32 %v1427_v7, %v1054_v2 }
  0x76   : > { %v746_v13 = vsel %vm582_vm2, %v500_v59, %v664_v5  ;;  %vm583_vm3 = vcmp.ge.f32.partialorder %v501_v6, 0.0  ;;  %v665_v9 = vmul.f32 0.01, %v501_v6  ;;  %v1057_v14 = vunpack.c.l.bf16 %v1110_v3 }
  0x77   : > { %828 = vst [vmem:[%s1203_s26 + $0x210] sm:$0xff] %v746_v13  ;;  %v502_v16 = vadd.f32 %v1438_v15, %v413_v0  ;;  %v503_v17 = vadd.f32 %v1438_v15, %v414_v8  ;;  %v504_v18 = vadd.f32 %v1438_v15, %v415_v10  ;;  %v505_v19 = vadd.f32 %v1438_v15, %v416_v11 }
  0x78   : > { %v747_v20 = vsel %vm583_vm3, %v501_v6, %v665_v9  ;;  %v417_v21 = vmul.f32 %v1427_v7, %v1057_v14  ;;  %v1058_v22 = vunpack.c.h.bf16 %v1110_v3  ;;  %v1061_v23 = vunpack.c.l.bf16 %v1111_v12 }
  0x79   : > { %829 = vst [vmem:[%s1203_s26 + $0x218] sm:$0xff] %v747_v20  ;;  %vm584_vm4 = vcmp.ge.f32.partialorder %v502_v16, 0.0  ;;  %v666_v25 = vmul.f32 0.01, %v502_v16  ;;  %vm585_vm5 = vcmp.ge.f32.partialorder %v503_v17, 0.0  ;;  %vm586_vm6 = vcmp.ge.f32.partialorder %v504_v18, 0.0 }
  0x7a   : > { %v667_v26 = vmul.f32 0.01, %v503_v17  ;;  %v668_v27 = vmul.f32 0.01, %v504_v18  ;;  %vm587_vm7 = vcmp.ge.f32.partialorder %v505_v19, 0.0  ;;  %v506_v31 = vadd.f32 %v1438_v15, %v417_v21 }
  0x7b   : > { %v669_v28 = vmul.f32 0.01, %v505_v19  ;;  %v748_v29 = vsel %vm584_vm4, %v502_v16, %v666_v25  ;;  %v418_v32 = vmul.f32 %v1427_v7, %v1058_v22  ;;  %v419_v36 = vmul.f32 %v1427_v7, %v1061_v23 }
  0x7c   : > { %v749_v30 = vsel %vm585_vm5, %v503_v17, %v667_v26  ;;  %830 = vst [vmem:[%s1203_s26 + $0x220] sm:$0xff] %v748_v29  ;;  %v750_v34 = vsel %vm586_vm6, %v504_v18, %v668_v27  ;;  %v1062_v37 = vunpack.c.h.bf16 %v1111_v12  ;;  %vm588_vm8 = vcmp.ge.f32.partialorder %v506_v31, 0.0 }
  0x7d   : > { %831 = vst [vmem:[%s1203_s26 + $0x228] sm:$0xff] %v749_v30  ;;  %v751_v35 = vsel %vm587_vm7, %v505_v19, %v669_v28  ;;  %832 = vst [vmem:[%s1203_s26 + $0x230] sm:$0xff] %v750_v34  ;;  %v670_v38 = vmul.f32 0.01, %v506_v31  ;;  %v507_v39 = vadd.f32 %v1438_v15, %v418_v32  ;;  %v1065_v40 = vunpack.c.l.bf16 %v1112_v24 }
  0x7e   : > { %833 = vst [vmem:[%s1203_s26 + $0x238] sm:$0xff] %v751_v35  ;;  %v508_v41 = vadd.f32 %v1438_v15, %v419_v36  ;;  %v420_v42 = vmul.f32 %v1427_v7, %v1062_v37  ;;  %v1066_v43 = vunpack.c.h.bf16 %v1112_v24  ;;  %v1069_v44 = vunpack.c.l.bf16 %v1113_v33 }
  0x7f   : > { %v752_v45 = vsel %vm588_vm8, %v506_v31, %v670_v38  ;;  %vm589_vm9 = vcmp.ge.f32.partialorder %v507_v39, 0.0  ;;  %v671_v46 = vmul.f32 0.01, %v507_v39  ;;  %v421_v47 = vmul.f32 %v1427_v7, %v1065_v40 }
  0x80   : > { %834 = vst [vmem:[%s1203_s26 + $0x240] sm:$0xff] %v752_v45  ;;  %vm590_vm10 = vcmp.ge.f32.partialorder %v508_v41, 0.0  ;;  %v672_v48 = vmul.f32 0.01, %v508_v41  ;;  %v509_v49 = vadd.f32 %v1438_v15, %v420_v42  ;;  %v422_v50 = vmul.f32 %v1427_v7, %v1066_v43 }
  0x81   : > { %v753_v51 = vsel %vm589_vm9, %v507_v39, %v671_v46  ;;  %v510_v52 = vadd.f32 %v1438_v15, %v421_v47  ;;  %v423_v53 = vmul.f32 %v1427_v7, %v1069_v44  ;;  %v1070_v54 = vunpack.c.h.bf16 %v1113_v33 }
  0x82   : > { %835 = vst [vmem:[%s1203_s26 + $0x248] sm:$0xff] %v753_v51  ;;  %v754_v56 = vsel %vm590_vm10, %v508_v41, %v672_v48  ;;  %vm591_vm11 = vcmp.ge.f32.partialorder %v509_v49, 0.0  ;;  %v673_v57 = vmul.f32 0.01, %v509_v49  ;;  %v511_v58 = vadd.f32 %v1438_v15, %v422_v50 }
  0x83   : > { %836 = vst [vmem:[%s1203_s26 + $0x250] sm:$0xff] %v754_v56  ;;  %vm592_vm12 = vcmp.ge.f32.partialorder %v510_v52, 0.0  ;;  %v674_v59 = vmul.f32 0.01, %v510_v52  ;;  %v512_v60 = vadd.f32 %v1438_v15, %v423_v53  ;;  %v424_v61 = vmul.f32 %v1427_v7, %v1070_v54 }
  0x84   : > { %v755_v62 = vsel %vm591_vm11, %v509_v49, %v673_v57  ;;  %vm593_vm13 = vcmp.ge.f32.partialorder %v511_v58, 0.0  ;;  %v675_v63 = vmul.f32 0.01, %v511_v58  ;;  %v1073_v1 = vunpack.c.l.bf16 %v1114_v55 }
  0x85   : > { %837 = vst [vmem:[%s1203_s26 + $0x258] sm:$0xff] %v755_v62  ;;  %v756_v2 = vsel %vm592_vm12, %v510_v52, %v674_v59  ;;  %vm594_vm14 = vcmp.ge.f32.partialorder %v512_v60, 0.0  ;;  %v676_v3 = vmul.f32 0.01, %v512_v60  ;;  %v513_v4 = vadd.f32 %v1438_v15, %v424_v61 }
  0x86   : > { %838 = vst [vmem:[%s1203_s26 + $0x260] sm:$0xff] %v756_v2  ;;  %v757_v5 = vsel %vm593_vm13, %v511_v58, %v675_v63  ;;  %v425_v6 = vmul.f32 %v1427_v7, %v1073_v1  ;;  %v1074_v0 = vunpack.c.h.bf16 %v1114_v55 }
  0x87   : > { %839 = vst [vmem:[%s1203_s26 + $0x268] sm:$0xff] %v757_v5  ;;  %v758_v8 = vsel %vm594_vm14, %v512_v60, %v676_v3  ;;  %vm595_vm15 = vcmp.ge.f32.partialorder %v513_v4, 0.0  ;;  %v677_v10 = vmul.f32 0.01, %v513_v4 }
  0x88   : > { %840 = vst [vmem:[%s1203_s26 + $0x270] sm:$0xff] %v758_v8  ;;  %v514_v11 = vadd.f32 %v1438_v15, %v425_v6  ;;  %v426_v12 = vmul.f32 %v1427_v7, %v1074_v0 }
  0x89   : > { %v759_v13 = vsel %vm595_vm15, %v513_v4, %v677_v10 }
  0x8a   : > { %841 = vst [vmem:[%s1203_s26 + $0x278] sm:$0xff] %v759_v13  ;;  %vm596_vm0 = vcmp.ge.f32.partialorder %v514_v11, 0.0  ;;  %v678_v9 = vmul.f32 0.01, %v514_v11  ;;  %v515_v14 = vadd.f32 %v1438_v15, %v426_v12 }
  0x8c   : > { %v760_v16 = vsel %vm596_vm0, %v514_v11, %v678_v9  ;;  %vm597_vm1 = vcmp.ge.f32.partialorder %v515_v14, 0.0  ;;  %v679_v17 = vmul.f32 0.01, %v515_v14 }
  0x8d   : > { %842 = vst [vmem:[%s1203_s26 + $0x280] sm:$0xff] %v760_v16 }
  0x8e   : > { %v761_v18 = vsel %vm597_vm1, %v515_v14, %v679_v17 }
  0x8f   : > { %843 = vst [vmem:[%s1203_s26 + $0x288] sm:$0xff] %v761_v18 }
  0x90 PF: > { %s13_s12 = sadd.s32 1, %s1131_s12  }
  0x91   : > { %p10_p4 = scmp.ge.s32.totalorder %s13_s12, 6  }
  0x93   :  { %12 = sbr.rel (!%p10_p4) target bundleno = 1 (0x1), region = 62 }

</bundles_post_ra>
